<compile_context>
chip_gen: v7x
topology: tpu7x:2x2x1
jax: 0.10.0
libtpu: 0.0.40
codegen_flags: <defaults>
</compile_context>

<pallas_src>
import functools

import jax
import jax.numpy as jnp
from jax.experimental import pallas as pl
from jax.experimental.pallas import tpu as pltpu


# ---------------------------------------------------------------------------
# Fused Pallas kernel (one grid step = one batch tile)
# ---------------------------------------------------------------------------

def _fused_forward_kernel(
    x_ref,        # [1, C, Ltile]  f32  channel-major, spatially padded, flat lanes
    shelf_ref,    # [BT, shelf]    f32
    goal_ref,     # [BT, goal]     f32
    convw_ref,    # [conv_ch, 9*C + 1]  bf16  (last column = conv bias)
    fcw_ref,      # [conv_ch*L, hidden] bf16  (zero rows at spatial-pad positions)
    fcb_ref,      # [1, hidden]    f32
    invw_ref, invb_ref,        # [shelf, hidden], [1, hidden]
    goalw_ref, goalb_ref,      # [goal, hidden],  [1, hidden]
    f1wi_ref, f1wv_ref, f1wg_ref, f1b_ref,   # [hidden, fh] x3, [1, fh]
    f2w_ref, f2b_ref,          # [fh, action], [1, action]
    o_ref,                     # [BT, action]
    patch_s,                   # VMEM scratch [9*C+1, BT*L] f32
    convT_s,                   # VMEM scratch [BT, conv_ch*L] f32
    *, BT, C, Hp, Wp, conv_ch,
):
    L = Hp * Wp
    N = BT * L
    GT = Wp + 1          # guard lanes on each side of the tile's flat image

    x = x_ref[0]                                           # [C, Ltile]

    # ---- im2col fused: 9 shifted lane-slices stacked as patch rows ---------
    for ki in range(3):
        for kj in range(3):
            tap = ki * 3 + kj
            d = (ki - 1) * Wp + (kj - 1)                   # |d| <= Wp+1 == GT
            patch_s[tap * C:(tap + 1) * C, :] = x[:, GT + d: GT + d + N]
    patch_s[9 * C:9 * C + 1, :] = jnp.ones((1, N), jnp.float32)   # bias row

    # ---- conv 3x3 / pad=1 as ONE MXU matmul (K = 9*C+1, bias folded) -------
    conv = jnp.dot(convw_ref[...], patch_s[...].astype(jnp.bfloat16),
                   preferred_element_type=jnp.float32)     # [conv_ch, BT*L]
    conv = jnp.maximum(conv, 0.0)

    # ---- relayout to NCHW-flat rows [BT, conv_ch*L] (store-path plumbing) --
    for co in range(conv_ch):
        for b in range(BT):
            convT_s[b:b + 1, co * L:(co + 1) * L] = conv[co:co + 1, b * L:(b + 1) * L]

    # ---- img_fc: ONE [BT, conv_ch*L] @ [conv_ch*L, hidden] matmul + ReLU ---
    x_img = (jnp.dot(convT_s[...].astype(jnp.bfloat16), fcw_ref[...],
                     preferred_element_type=jnp.float32) + fcb_ref[...])
    x_img = jnp.maximum(x_img, 0.0)

    # ---- inventory / goal networks -----------------------------------------
    x_inv = jnp.maximum(
        jnp.dot(shelf_ref[...], invw_ref[...], preferred_element_type=jnp.float32)
        + invb_ref[...], 0.0)
    x_goal = jnp.maximum(
        jnp.dot(goal_ref[...], goalw_ref[...], preferred_element_type=jnp.float32)
        + goalb_ref[...], 0.0)

    # ---- final: concat -> Linear -> ReLU -> Linear -> softmax --------------
    # concat([x_img, x_inv, x_goal]) @ W1 == x_img@W1i + x_inv@W1v + x_goal@W1g
    h = (jnp.dot(x_img, f1wi_ref[...], preferred_element_type=jnp.float32)
         + jnp.dot(x_inv, f1wv_ref[...], preferred_element_type=jnp.float32)
         + jnp.dot(x_goal, f1wg_ref[...], preferred_element_type=jnp.float32)
         + f1b_ref[...])
    h = jnp.maximum(h, 0.0)
    logits = (jnp.dot(h, f2w_ref[...], preferred_element_type=jnp.float32)
              + f2b_ref[...])
    m = jnp.max(logits, axis=-1, keepdims=True)
    e = jnp.exp(logits - m)
    probs = e / jnp.sum(e, axis=-1, keepdims=True)         # exact normalization
    o_ref[...] = probs.astype(o_ref.dtype)


# ---------------------------------------------------------------------------
# Forward pass wrapper (mirrors FoodNetworkPartialObsGoal.forward)
# ---------------------------------------------------------------------------

def food_network_forward(obs, params, sizes, img_shape, block_b=None):
    if obs.ndim < 2:
        obs = obs[None, :]

    # split obs along dim 1 exactly like torch.narrow in the reference
    cumsum = 0
    arrs = []
    for size in sizes:
        arrs.append(obs[:, cumsum:cumsum + size])
        cumsum += size
    assert cumsum == obs.shape[1], "not all of obs used"
    img, shelf, goal = arrs

    B = obs.shape[0]
    C, H, W = img_shape
    Hp, Wp = H + 2, W + 2          # conv padding=1 folded into the data
    L = Hp * Wp
    GT = Wp + 1                    # >= max |shift| of the 3x3 taps

    conv_ch = params["conv_b"].shape[0]
    hidden = params["fc_b"].shape[1]
    action_dim = params["f2_w"].shape[1]
    shelf_size = shelf.shape[1]
    goal_size = goal.shape[1]

    # batch tile (grid over B, "parallel" -> megacore shard on v7x)
    BT = B if block_b is None else min(block_b, B)
    assert BT == B or BT % 8 == 0, "batch tile must be full batch or a multiple of 8"
    Bp = ((B + BT - 1) // BT) * BT
    n_tiles = Bp // BT
    Ltile = BT * L + 2 * GT

    # ---- image prep: spatial zero-pad + per-tile channel-major flat lanes --
    x4 = img.reshape(B, C, H, W).astype(jnp.float32)
    x4 = jnp.pad(x4, ((0, Bp - B), (0, 0), (1, 1), (1, 1)))        # [Bp, C, Hp, Wp]
    xl = x4.reshape(n_tiles, BT, C, L).transpose(0, 2, 1, 3)       # [nt, C, BT, L]
    xl = xl.reshape(n_tiles, C, BT * L)
    xt = jnp.pad(xl, ((0, 0), (0, 0), (GT, GT)))                   # [nt, C, Ltile]
    # TODO(synk): for very large B fold this transpose into per-tile DMA instead
    # of a standalone XLA transpose over the whole image in HBM.

    shelf_p = jnp.pad(shelf.astype(jnp.float32), ((0, Bp - B), (0, 0)))
    goal_p = jnp.pad(goal.astype(jnp.float32), ((0, Bp - B), (0, 0)))

    # ---- weight relayouts (tiny XLA ops; weights are synthetic) ------------
    # conv: [9*conv_ch, C] (row = tap*conv_ch + co) -> [conv_ch, 9*C] + bias col
    wc = params["conv_w"].reshape(9, conv_ch, C).transpose(1, 0, 2)
    wc = wc.reshape(conv_ch, 9 * C)
    wc = jnp.concatenate([wc, params["conv_b"]], axis=1).astype(jnp.bfloat16)
    # img_fc: NCHW-flat rows -> padded-spatial rows (zero rows at pad positions)
    fw = params["fc_w"].reshape(conv_ch, H, W, hidden)
    fw = jnp.pad(fw, ((0, 0), (1, 1), (1, 1), (0, 0)))
    fw = fw.reshape(conv_ch * L, hidden).astype(jnp.bfloat16)

    kernel = functools.partial(
        _fused_forward_kernel, BT=BT, C=C, Hp=Hp, Wp=Wp, conv_ch=conv_ch)

    def _pin(a):
        nd = a.ndim

        def idx(i):
            return (0,) * nd

        return pl.BlockSpec(a.shape, idx)

    weights = (wc, fw, params["fc_b"],
               params["inv_w"], params["inv_b"],
               params["goal_w"], params["goal_b"],
               params["f1_wi"], params["f1_wv"], params["f1_wg"], params["f1_b"],
               params["f2_w"], params["f2_b"])

    out = pl.pallas_call(
        kernel,
        out_shape=jax.ShapeDtypeStruct((Bp, action_dim), jnp.float32),
        grid=(n_tiles,),
        in_specs=[
            pl.BlockSpec((1, C, Ltile), lambda i: (i, 0, 0)),
            pl.BlockSpec((BT, shelf_size), lambda i: (i, 0)),
            pl.BlockSpec((BT, goal_size), lambda i: (i, 0)),
        ] + [_pin(w) for w in weights],
        out_specs=pl.BlockSpec((BT, action_dim), lambda i: (i, 0)),
        scratch_shapes=[
            pltpu.VMEM((9 * C + 1, BT * L), jnp.float32),   # im2col patch
            pltpu.VMEM((BT, conv_ch * L), jnp.float32),     # NCHW-flat conv act
        ],
        compiler_params=pltpu.CompilerParams(
            dimension_semantics=("parallel",)),
    )(xt, shelf_p, goal_p, *weights)
    return out[:B]


# ---------------------------------------------------------------------------
# Pure-JAX reference (same math, used only for the correctness check)
# ---------------------------------------------------------------------------

def food_network_reference(obs, params, sizes, img_shape):
    if obs.ndim < 2:
        obs = obs[None, :]
    cumsum = 0
    arrs = []
    for size in sizes:
        arrs.append(obs[:, cumsum:cumsum + size])
        cumsum += size
    img, shelf, goal = arrs
    B = obs.shape[0]
    C, H, W = img_shape
    conv_ch = params["conv_b"].shape[0]

    x = img.reshape(B, C, H, W)
    xp = jnp.pad(x, ((0, 0), (0, 0), (1, 1), (1, 1)))
    conv = jnp.zeros((B, conv_ch, H, W), jnp.float32)
    for ki in range(3):
        for kj in range(3):
            tap = ki * 3 + kj
            w_tap = params["conv_w"][tap * conv_ch:(tap + 1) * conv_ch, :]  # [co, c]
            xs = xp[:, :, ki:ki + H, kj:kj + W]                             # [B, C, H, W]
            conv = conv + jnp.einsum("oc,bchw->bohw", w_tap, xs)
    conv = jax.nn.relu(conv + params["conv_b"].reshape(1, conv_ch, 1, 1))
    flat = conv.reshape(B, conv_ch * H * W)                                 # NCHW flatten
    x_img = jax.nn.relu(flat @ params["fc_w"] + params["fc_b"])
    x_inv = jax.nn.relu(shelf @ params["inv_w"] + params["inv_b"])
    x_goal = jax.nn.relu(goal @ params["goal_w"] + params["goal_b"])
    h = jax.nn.relu(x_img @ params["f1_wi"] + x_inv @ params["f1_wv"]
                    + x_goal @ params["f1_wg"] + params["f1_b"])
    logits = h @ params["f2_w"] + params["f2_b"]
    return jax.nn.softmax(logits, axis=-1)


# ---------------------------------------------------------------------------
# Deterministic parameter init
# ---------------------------------------------------------------------------

def init_params(key, *, c_in, conv_ch, h, w, shelf_size, goal_size,
                hidden, final_hidden, action_dim):
    ks = jax.random.split(key, 14)
    s = 0.05
    img_flat = conv_ch * h * w
    n = jax.random.normal
    return {
        # conv weight rows: tap-major, out-channel minor; cols: in-channel
        "conv_w": s * n(ks[0], (9 * conv_ch, c_in), jnp.float32),
        "conv_b": s * n(ks[1], (conv_ch, 1), jnp.float32),
        # fc weight rows in PyTorch NCHW-flatten order (out_ch * H*W + spatial)
        "fc_w": s * n(ks[2], (img_flat, hidden), jnp.float32),
        "fc_b": s * n(ks[3], (1, hidden), jnp.float32),
        "inv_w": s * n(ks[4], (shelf_size, hidden), jnp.float32),
        "inv_b": s * n(ks[5], (1, hidden), jnp.float32),
        "goal_w": s * n(ks[6], (goal_size, hidden), jnp.float32),
        "goal_b": s * n(ks[7], (1, hidden), jnp.float32),
        # final layer 1, split by input segment (img / inventory / goal)
        "f1_wi": s * n(ks[8], (hidden, final_hidden), jnp.float32),
        "f1_wv": s * n(ks[9], (hidden, final_hidden), jnp.float32),
        "f1_wg": s * n(ks[10], (hidden, final_hidden), jnp.float32),
        "f1_b": s * n(ks[11], (1, final_hidden), jnp.float32),
        "f2_w": s * n(ks[12], (final_hidden, action_dim), jnp.float32),
        "f2_b": s * n(ks[13], (1, action_dim), jnp.float32),
    }


# ---------------------------------------------------------------------------

if __name__ == "__main__":
    B = 2
    C, H, W = 4, 16, 16
    SHELF, GOAL = 8, 8
    HIDDEN, FINAL_HIDDEN, ACTION_DIM, CONV_CH = 32, 64, 6, 8
    sizes = (C * H * W, SHELF, GOAL)          # [1024, 8, 8]

    root = jax.random.PRNGKey(0)
    k_params, k_obs = jax.random.split(root)

    params = init_params(
        k_params, c_in=C, conv_ch=CONV_CH, h=H, w=W,
        shelf_size=SHELF, goal_size=GOAL,
        hidden=HIDDEN, final_hidden=FINAL_HIDDEN, action_dim=ACTION_DIM)

    obs = jax.random.normal(k_obs, (B, sum(sizes)), dtype=jnp.float32)

    fwd = jax.jit(functools.partial(
        food_network_forward, sizes=sizes, img_shape=(C, H, W)))
    out = jax.block_until_ready(fwd(obs, params))

    assert out.shape == (B, ACTION_DIM)
    assert bool(jnp.all(jnp.isfinite(out)))
    # exact softmax -> rows sum to 1 up to f32 rounding
    assert bool(jnp.allclose(jnp.sum(out, axis=-1), 1.0, atol=1e-5))
    # matches the pure-JAX f32 reference (kernel uses bf16 MXU operands on the
    # conv / img_fc path, hence the modest tolerance)
    ref = food_network_reference(obs, params, sizes, (C, H, W))
    assert bool(jnp.allclose(out, ref, atol=5e-3, rtol=1e-2))
    print("KERNEL_OK")
</pallas_src>

<mosaic_0001>
module attributes {stable_mosaic.version = 11 : i64} {
  func.func @_fused_forward_kernel(%arg0: i32, %arg1: memref<1x4x686xf32, #tpu.memory_space<vmem>>, %arg2: memref<2x8xf32, #tpu.memory_space<vmem>>, %arg3: memref<2x8xf32, #tpu.memory_space<vmem>>, %arg4: memref<8x37xbf16, #tpu.memory_space<vmem>>, %arg5: memref<2592x32xbf16, #tpu.memory_space<vmem>>, %arg6: memref<1x32xf32, #tpu.memory_space<vmem>>, %arg7: memref<8x32xf32, #tpu.memory_space<vmem>>, %arg8: memref<1x32xf32, #tpu.memory_space<vmem>>, %arg9: memref<8x32xf32, #tpu.memory_space<vmem>>, %arg10: memref<1x32xf32, #tpu.memory_space<vmem>>, %arg11: memref<32x64xf32, #tpu.memory_space<vmem>>, %arg12: memref<32x64xf32, #tpu.memory_space<vmem>>, %arg13: memref<32x64xf32, #tpu.memory_space<vmem>>, %arg14: memref<1x64xf32, #tpu.memory_space<vmem>>, %arg15: memref<64x6xf32, #tpu.memory_space<vmem>>, %arg16: memref<1x6xf32, #tpu.memory_space<vmem>>, %arg17: memref<2x6xf32, #tpu.memory_space<vmem>>, %arg18: memref<37x648xf32, #tpu.memory_space<vmem>>, %arg19: memref<2x2592xf32, #tpu.memory_space<vmem>>) attributes {dimension_semantics = [#tpu.dimension_semantics<parallel>], iteration_bounds = array<i64: 1>, scalar_prefetch = 0 : i64, scratch_operands = 2 : i64, tpu.core_type = #tpu.core_type<tc>, window_params = [{transform_indices = @transform_0, window_bounds = array<i64: 1, 4, 686>}, {transform_indices = @transform_1, window_bounds = array<i64: 2, 8>}, {transform_indices = @transform_2, window_bounds = array<i64: 2, 8>}, {pipeline_mode = #tpu.pipeline_mode<synchronous>, transform_indices = @transform_3, window_bounds = array<i64: 8, 37>}, {pipeline_mode = #tpu.pipeline_mode<synchronous>, transform_indices = @transform_4, window_bounds = array<i64: 2592, 32>}, {pipeline_mode = #tpu.pipeline_mode<synchronous>, transform_indices = @transform_5, window_bounds = array<i64: 1, 32>}, {pipeline_mode = #tpu.pipeline_mode<synchronous>, transform_indices = @transform_6, window_bounds = array<i64: 8, 32>}, {pipeline_mode = #tpu.pipeline_mode<synchronous>, transform_indices = @transform_7, window_bounds = array<i64: 1, 32>}, {pipeline_mode = #tpu.pipeline_mode<synchronous>, transform_indices = @transform_8, window_bounds = array<i64: 8, 32>}, {pipeline_mode = #tpu.pipeline_mode<synchronous>, transform_indices = @transform_9, window_bounds = array<i64: 1, 32>}, {pipeline_mode = #tpu.pipeline_mode<synchronous>, transform_indices = @transform_10, window_bounds = array<i64: 32, 64>}, {pipeline_mode = #tpu.pipeline_mode<synchronous>, transform_indices = @transform_11, window_bounds = array<i64: 32, 64>}, {pipeline_mode = #tpu.pipeline_mode<synchronous>, transform_indices = @transform_12, window_bounds = array<i64: 32, 64>}, {pipeline_mode = #tpu.pipeline_mode<synchronous>, transform_indices = @transform_13, window_bounds = array<i64: 1, 64>}, {pipeline_mode = #tpu.pipeline_mode<synchronous>, transform_indices = @transform_14, window_bounds = array<i64: 64, 6>}, {pipeline_mode = #tpu.pipeline_mode<synchronous>, transform_indices = @transform_15, window_bounds = array<i64: 1, 6>}, {transform_indices = @transform_16, window_bounds = array<i64: 2, 6>}]} {
    %c0 = arith.constant 0 : index
    %c0_0 = arith.constant 0 : index
    %c0_1 = arith.constant 0 : index
    %0 = vector.load %arg1[%c0, %c0_0, %c0_1] : memref<1x4x686xf32, #tpu.memory_space<vmem>>, vector<1x4x686xf32>
    %1 = vector.shape_cast %0 : vector<1x4x686xf32> to vector<4x686xf32>
    %2 = vector.extract_strided_slice %1 {offsets = [0, 0], sizes = [4, 648], strides = [1, 1]} : vector<4x686xf32> to vector<4x648xf32>
    %c0_2 = arith.constant 0 : index
    %c0_3 = arith.constant 0 : index
    %3 = vector.load %arg18[%c0_2, %c0_3] : memref<37x648xf32, #tpu.memory_space<vmem>>, vector<4x648xf32>
    tpu.vector_store %arg18[%c0_2, %c0_3], %2 {strides = array<i32>} : memref<37x648xf32, #tpu.memory_space<vmem>>, vector<4x648xf32>,
    %4 = vector.extract_strided_slice %1 {offsets = [0, 1], sizes = [4, 648], strides = [1, 1]} : vector<4x686xf32> to vector<4x648xf32>
    %c4 = arith.constant 4 : index
    %c0_4 = arith.constant 0 : index
    %5 = vector.load %arg18[%c4, %c0_4] : memref<37x648xf32, #tpu.memory_space<vmem>>, vector<4x648xf32>
    tpu.vector_store %arg18[%c4, %c0_4], %4 {strides = array<i32>} : memref<37x648xf32, #tpu.memory_space<vmem>>, vector<4x648xf32>,
    %6 = vector.extract_strided_slice %1 {offsets = [0, 2], sizes = [4, 648], strides = [1, 1]} : vector<4x686xf32> to vector<4x648xf32>
    %c8 = arith.constant 8 : index
    %c0_5 = arith.constant 0 : index
    %7 = vector.load %arg18[%c8, %c0_5] : memref<37x648xf32, #tpu.memory_space<vmem>>, vector<4x648xf32>
    tpu.vector_store %arg18[%c8, %c0_5], %6 {strides = array<i32>} : memref<37x648xf32, #tpu.memory_space<vmem>>, vector<4x648xf32>,
    %8 = vector.extract_strided_slice %1 {offsets = [0, 18], sizes = [4, 648], strides = [1, 1]} : vector<4x686xf32> to vector<4x648xf32>
    %c12 = arith.constant 12 : index
    %c0_6 = arith.constant 0 : index
    %9 = vector.load %arg18[%c12, %c0_6] : memref<37x648xf32, #tpu.memory_space<vmem>>, vector<4x648xf32>
    tpu.vector_store %arg18[%c12, %c0_6], %8 {strides = array<i32>} : memref<37x648xf32, #tpu.memory_space<vmem>>, vector<4x648xf32>,
    %10 = vector.extract_strided_slice %1 {offsets = [0, 19], sizes = [4, 648], strides = [1, 1]} : vector<4x686xf32> to vector<4x648xf32>
    %c16 = arith.constant 16 : index
    %c0_7 = arith.constant 0 : index
    %11 = vector.load %arg18[%c16, %c0_7] : memref<37x648xf32, #tpu.memory_space<vmem>>, vector<4x648xf32>
    tpu.vector_store %arg18[%c16, %c0_7], %10 {strides = array<i32>} : memref<37x648xf32, #tpu.memory_space<vmem>>, vector<4x648xf32>,
    %12 = vector.extract_strided_slice %1 {offsets = [0, 20], sizes = [4, 648], strides = [1, 1]} : vector<4x686xf32> to vector<4x648xf32>
    %c20 = arith.constant 20 : index
    %c0_8 = arith.constant 0 : index
    %13 = vector.load %arg18[%c20, %c0_8] : memref<37x648xf32, #tpu.memory_space<vmem>>, vector<4x648xf32>
    tpu.vector_store %arg18[%c20, %c0_8], %12 {strides = array<i32>} : memref<37x648xf32, #tpu.memory_space<vmem>>, vector<4x648xf32>,
    %14 = vector.extract_strided_slice %1 {offsets = [0, 36], sizes = [4, 648], strides = [1, 1]} : vector<4x686xf32> to vector<4x648xf32>
    %c24 = arith.constant 24 : index
    %c0_9 = arith.constant 0 : index
    %15 = vector.load %arg18[%c24, %c0_9] : memref<37x648xf32, #tpu.memory_space<vmem>>, vector<4x648xf32>
    tpu.vector_store %arg18[%c24, %c0_9], %14 {strides = array<i32>} : memref<37x648xf32, #tpu.memory_space<vmem>>, vector<4x648xf32>,
    %16 = vector.extract_strided_slice %1 {offsets = [0, 37], sizes = [4, 648], strides = [1, 1]} : vector<4x686xf32> to vector<4x648xf32>
    %c28 = arith.constant 28 : index
    %c0_10 = arith.constant 0 : index
    %17 = vector.load %arg18[%c28, %c0_10] : memref<37x648xf32, #tpu.memory_space<vmem>>, vector<4x648xf32>
    tpu.vector_store %arg18[%c28, %c0_10], %16 {strides = array<i32>} : memref<37x648xf32, #tpu.memory_space<vmem>>, vector<4x648xf32>,
    %18 = vector.extract_strided_slice %1 {offsets = [0, 38], sizes = [4, 648], strides = [1, 1]} : vector<4x686xf32> to vector<4x648xf32>
    %c32 = arith.constant 32 : index
    %c0_11 = arith.constant 0 : index
    %19 = vector.load %arg18[%c32, %c0_11] : memref<37x648xf32, #tpu.memory_space<vmem>>, vector<4x648xf32>
    tpu.vector_store %arg18[%c32, %c0_11], %18 {strides = array<i32>} : memref<37x648xf32, #tpu.memory_space<vmem>>, vector<4x648xf32>,
    %cst = arith.constant 1.000000e+00 : f32
    %20 = vector.broadcast %cst : f32 to vector<1x648xf32>
    %c36 = arith.constant 36 : index
    %c0_12 = arith.constant 0 : index
    %21 = vector.load %arg18[%c36, %c0_12] : memref<37x648xf32, #tpu.memory_space<vmem>>, vector<1x648xf32>
    tpu.vector_store %arg18[%c36, %c0_12], %20 {strides = array<i32>} : memref<37x648xf32, #tpu.memory_space<vmem>>, vector<1x648xf32>,
    %c0_13 = arith.constant 0 : index
    %c0_14 = arith.constant 0 : index
    %22 = vector.load %arg4[%c0_13, %c0_14] : memref<8x37xbf16, #tpu.memory_space<vmem>>, vector<8x37xbf16>
    %c0_15 = arith.constant 0 : index
    %c0_16 = arith.constant 0 : index
    %23 = vector.load %arg18[%c0_15, %c0_16] : memref<37x648xf32, #tpu.memory_space<vmem>>, vector<37x648xf32>
    %24 = arith.truncf %23 : vector<37x648xf32> to vector<37x648xbf16>
    %cst_17 = arith.constant dense<0.000000e+00> : vector<8x648xf32>
    %25 = tpu.matmul %22, %24, %cst_17 {dimension_numbers = #tpu.dot_dimension_numbers<[1], [0], [0], [1], [0, 0, 1, 1], [], []>} : vector<8x37xbf16>, vector<37x648xbf16>, vector<8x648xf32> -> vector<8x648xf32>
    %cst_18 = arith.constant 0.000000e+00 : f32
    %26 = vector.broadcast %cst_18 : f32 to vector<8x648xf32>
    %27 = arith.maximumf %25, %26 : vector<8x648xf32>
    %28 = vector.extract_strided_slice %27 {offsets = [0, 0], sizes = [1, 324], strides = [1, 1]} : vector<8x648xf32> to vector<1x324xf32>
    %c0_19 = arith.constant 0 : index
    %c0_20 = arith.constant 0 : index
    %29 = vector.load %arg19[%c0_19, %c0_20] : memref<2x2592xf32, #tpu.memory_space<vmem>>, vector<1x324xf32>
    tpu.vector_store %arg19[%c0_19, %c0_20], %28 {strides = array<i32>} : memref<2x2592xf32, #tpu.memory_space<vmem>>, vector<1x324xf32>,
    %30 = vector.extract_strided_slice %27 {offsets = [0, 324], sizes = [1, 324], strides = [1, 1]} : vector<8x648xf32> to vector<1x324xf32>
    %c1 = arith.constant 1 : index
    %c0_21 = arith.constant 0 : index
    %31 = vector.load %arg19[%c1, %c0_21] : memref<2x2592xf32, #tpu.memory_space<vmem>>, vector<1x324xf32>
    tpu.vector_store %arg19[%c1, %c0_21], %30 {strides = array<i32>} : memref<2x2592xf32, #tpu.memory_space<vmem>>, vector<1x324xf32>,
    %32 = vector.extract_strided_slice %27 {offsets = [1, 0], sizes = [1, 324], strides = [1, 1]} : vector<8x648xf32> to vector<1x324xf32>
    %c0_22 = arith.constant 0 : index
    %c324 = arith.constant 324 : index
    %33 = vector.load %arg19[%c0_22, %c324] : memref<2x2592xf32, #tpu.memory_space<vmem>>, vector<1x324xf32>
    tpu.vector_store %arg19[%c0_22, %c324], %32 {strides = array<i32>} : memref<2x2592xf32, #tpu.memory_space<vmem>>, vector<1x324xf32>,
    %34 = vector.extract_strided_slice %27 {offsets = [1, 324], sizes = [1, 324], strides = [1, 1]} : vector<8x648xf32> to vector<1x324xf32>
    %c1_23 = arith.constant 1 : index
    %c324_24 = arith.constant 324 : index
    %35 = vector.load %arg19[%c1_23, %c324_24] : memref<2x2592xf32, #tpu.memory_space<vmem>>, vector<1x324xf32>
    tpu.vector_store %arg19[%c1_23, %c324_24], %34 {strides = array<i32>} : memref<2x2592xf32, #tpu.memory_space<vmem>>, vector<1x324xf32>,
    %36 = vector.extract_strided_slice %27 {offsets = [2, 0], sizes = [1, 324], strides = [1, 1]} : vector<8x648xf32> to vector<1x324xf32>
    %c0_25 = arith.constant 0 : index
    %c648 = arith.constant 648 : index
    %37 = vector.load %arg19[%c0_25, %c648] : memref<2x2592xf32, #tpu.memory_space<vmem>>, vector<1x324xf32>
    tpu.vector_store %arg19[%c0_25, %c648], %36 {strides = array<i32>} : memref<2x2592xf32, #tpu.memory_space<vmem>>, vector<1x324xf32>,
    %38 = vector.extract_strided_slice %27 {offsets = [2, 324], sizes = [1, 324], strides = [1, 1]} : vector<8x648xf32> to vector<1x324xf32>
    %c1_26 = arith.constant 1 : index
    %c648_27 = arith.constant 648 : index
    %39 = vector.load %arg19[%c1_26, %c648_27] : memref<2x2592xf32, #tpu.memory_space<vmem>>, vector<1x324xf32>
    tpu.vector_store %arg19[%c1_26, %c648_27], %38 {strides = array<i32>} : memref<2x2592xf32, #tpu.memory_space<vmem>>, vector<1x324xf32>,
    %40 = vector.extract_strided_slice %27 {offsets = [3, 0], sizes = [1, 324], strides = [1, 1]} : vector<8x648xf32> to vector<1x324xf32>
    %c0_28 = arith.constant 0 : index
    %c972 = arith.constant 972 : index
    %41 = vector.load %arg19[%c0_28, %c972] : memref<2x2592xf32, #tpu.memory_space<vmem>>, vector<1x324xf32>
    tpu.vector_store %arg19[%c0_28, %c972], %40 {strides = array<i32>} : memref<2x2592xf32, #tpu.memory_space<vmem>>, vector<1x324xf32>,
    %42 = vector.extract_strided_slice %27 {offsets = [3, 324], sizes = [1, 324], strides = [1, 1]} : vector<8x648xf32> to vector<1x324xf32>
    %c1_29 = arith.constant 1 : index
    %c972_30 = arith.constant 972 : index
    %43 = vector.load %arg19[%c1_29, %c972_30] : memref<2x2592xf32, #tpu.memory_space<vmem>>, vector<1x324xf32>
    tpu.vector_store %arg19[%c1_29, %c972_30], %42 {strides = array<i32>} : memref<2x2592xf32, #tpu.memory_space<vmem>>, vector<1x324xf32>,
    %44 = vector.extract_strided_slice %27 {offsets = [4, 0], sizes = [1, 324], strides = [1, 1]} : vector<8x648xf32> to vector<1x324xf32>
    %c0_31 = arith.constant 0 : index
    %c1296 = arith.constant 1296 : index
    %45 = vector.load %arg19[%c0_31, %c1296] : memref<2x2592xf32, #tpu.memory_space<vmem>>, vector<1x324xf32>
    tpu.vector_store %arg19[%c0_31, %c1296], %44 {strides = array<i32>} : memref<2x2592xf32, #tpu.memory_space<vmem>>, vector<1x324xf32>,
    %46 = vector.extract_strided_slice %27 {offsets = [4, 324], sizes = [1, 324], strides = [1, 1]} : vector<8x648xf32> to vector<1x324xf32>
    %c1_32 = arith.constant 1 : index
    %c1296_33 = arith.constant 1296 : index
    %47 = vector.load %arg19[%c1_32, %c1296_33] : memref<2x2592xf32, #tpu.memory_space<vmem>>, vector<1x324xf32>
    tpu.vector_store %arg19[%c1_32, %c1296_33], %46 {strides = array<i32>} : memref<2x2592xf32, #tpu.memory_space<vmem>>, vector<1x324xf32>,
    %48 = vector.extract_strided_slice %27 {offsets = [5, 0], sizes = [1, 324], strides = [1, 1]} : vector<8x648xf32> to vector<1x324xf32>
    %c0_34 = arith.constant 0 : index
    %c1620 = arith.constant 1620 : index
    %49 = vector.load %arg19[%c0_34, %c1620] : memref<2x2592xf32, #tpu.memory_space<vmem>>, vector<1x324xf32>
    tpu.vector_store %arg19[%c0_34, %c1620], %48 {strides = array<i32>} : memref<2x2592xf32, #tpu.memory_space<vmem>>, vector<1x324xf32>,
    %50 = vector.extract_strided_slice %27 {offsets = [5, 324], sizes = [1, 324], strides = [1, 1]} : vector<8x648xf32> to vector<1x324xf32>
    %c1_35 = arith.constant 1 : index
    %c1620_36 = arith.constant 1620 : index
    %51 = vector.load %arg19[%c1_35, %c1620_36] : memref<2x2592xf32, #tpu.memory_space<vmem>>, vector<1x324xf32>
    tpu.vector_store %arg19[%c1_35, %c1620_36], %50 {strides = array<i32>} : memref<2x2592xf32, #tpu.memory_space<vmem>>, vector<1x324xf32>,
    %52 = vector.extract_strided_slice %27 {offsets = [6, 0], sizes = [1, 324], strides = [1, 1]} : vector<8x648xf32> to vector<1x324xf32>
    %c0_37 = arith.constant 0 : index
    %c1944 = arith.constant 1944 : index
    %53 = vector.load %arg19[%c0_37, %c1944] : memref<2x2592xf32, #tpu.memory_space<vmem>>, vector<1x324xf32>
    tpu.vector_store %arg19[%c0_37, %c1944], %52 {strides = array<i32>} : memref<2x2592xf32, #tpu.memory_space<vmem>>, vector<1x324xf32>,
    %54 = vector.extract_strided_slice %27 {offsets = [6, 324], sizes = [1, 324], strides = [1, 1]} : vector<8x648xf32> to vector<1x324xf32>
    %c1_38 = arith.constant 1 : index
    %c1944_39 = arith.constant 1944 : index
    %55 = vector.load %arg19[%c1_38, %c1944_39] : memref<2x2592xf32, #tpu.memory_space<vmem>>, vector<1x324xf32>
    tpu.vector_store %arg19[%c1_38, %c1944_39], %54 {strides = array<i32>} : memref<2x2592xf32, #tpu.memory_space<vmem>>, vector<1x324xf32>,
    %56 = vector.extract_strided_slice %27 {offsets = [7, 0], sizes = [1, 324], strides = [1, 1]} : vector<8x648xf32> to vector<1x324xf32>
    %c0_40 = arith.constant 0 : index
    %c2268 = arith.constant 2268 : index
    %57 = vector.load %arg19[%c0_40, %c2268] : memref<2x2592xf32, #tpu.memory_space<vmem>>, vector<1x324xf32>
    tpu.vector_store %arg19[%c0_40, %c2268], %56 {strides = array<i32>} : memref<2x2592xf32, #tpu.memory_space<vmem>>, vector<1x324xf32>,
    %58 = vector.extract_strided_slice %27 {offsets = [7, 324], sizes = [1, 324], strides = [1, 1]} : vector<8x648xf32> to vector<1x324xf32>
    %c1_41 = arith.constant 1 : index
    %c2268_42 = arith.constant 2268 : index
    %59 = vector.load %arg19[%c1_41, %c2268_42] : memref<2x2592xf32, #tpu.memory_space<vmem>>, vector<1x324xf32>
    tpu.vector_store %arg19[%c1_41, %c2268_42], %58 {strides = array<i32>} : memref<2x2592xf32, #tpu.memory_space<vmem>>, vector<1x324xf32>,
    %c0_43 = arith.constant 0 : index
    %c0_44 = arith.constant 0 : index
    %60 = vector.load %arg19[%c0_43, %c0_44] : memref<2x2592xf32, #tpu.memory_space<vmem>>, vector<2x2592xf32>
    %61 = arith.truncf %60 : vector<2x2592xf32> to vector<2x2592xbf16>
    %c0_45 = arith.constant 0 : index
    %c0_46 = arith.constant 0 : index
    %62 = vector.load %arg5[%c0_45, %c0_46] : memref<2592x32xbf16, #tpu.memory_space<vmem>>, vector<2592x32xbf16>
    %cst_47 = arith.constant dense<0.000000e+00> : vector<2x32xf32>
    %63 = tpu.matmul %61, %62, %cst_47 {dimension_numbers = #tpu.dot_dimension_numbers<[1], [0], [0], [1], [0, 0, 1, 1], [], []>} : vector<2x2592xbf16>, vector<2592x32xbf16>, vector<2x32xf32> -> vector<2x32xf32>
    %c0_48 = arith.constant 0 : index
    %c0_49 = arith.constant 0 : index
    %64 = vector.load %arg6[%c0_48, %c0_49] : memref<1x32xf32, #tpu.memory_space<vmem>>, vector<1x32xf32>
    %65 = vector.broadcast %64 : vector<1x32xf32> to vector<2x32xf32>
    %66 = arith.addf %63, %65 : vector<2x32xf32>
    %cst_50 = arith.constant 0.000000e+00 : f32
    %67 = vector.broadcast %cst_50 : f32 to vector<2x32xf32>
    %68 = arith.maximumf %66, %67 : vector<2x32xf32>
    %c0_51 = arith.constant 0 : index
    %c0_52 = arith.constant 0 : index
    %69 = vector.load %arg2[%c0_51, %c0_52] : memref<2x8xf32, #tpu.memory_space<vmem>>, vector<2x8xf32>
    %c0_53 = arith.constant 0 : index
    %c0_54 = arith.constant 0 : index
    %70 = vector.load %arg7[%c0_53, %c0_54] : memref<8x32xf32, #tpu.memory_space<vmem>>, vector<8x32xf32>
    %cst_55 = arith.constant dense<0.000000e+00> : vector<2x32xf32>
    %71 = tpu.matmul %69, %70, %cst_55 {dimension_numbers = #tpu.dot_dimension_numbers<[1], [0], [0], [1], [0, 0, 1, 1], [], []>} : vector<2x8xf32>, vector<8x32xf32>, vector<2x32xf32> -> vector<2x32xf32>
    %c0_56 = arith.constant 0 : index
    %c0_57 = arith.constant 0 : index
    %72 = vector.load %arg8[%c0_56, %c0_57] : memref<1x32xf32, #tpu.memory_space<vmem>>, vector<1x32xf32>
    %73 = vector.broadcast %72 : vector<1x32xf32> to vector<2x32xf32>
    %74 = arith.addf %71, %73 : vector<2x32xf32>
    %cst_58 = arith.constant 0.000000e+00 : f32
    %75 = vector.broadcast %cst_58 : f32 to vector<2x32xf32>
    %76 = arith.maximumf %74, %75 : vector<2x32xf32>
    %c0_59 = arith.constant 0 : index
    %c0_60 = arith.constant 0 : index
    %77 = vector.load %arg3[%c0_59, %c0_60] : memref<2x8xf32, #tpu.memory_space<vmem>>, vector<2x8xf32>
    %c0_61 = arith.constant 0 : index
    %c0_62 = arith.constant 0 : index
    %78 = vector.load %arg9[%c0_61, %c0_62] : memref<8x32xf32, #tpu.memory_space<vmem>>, vector<8x32xf32>
    %cst_63 = arith.constant dense<0.000000e+00> : vector<2x32xf32>
    %79 = tpu.matmul %77, %78, %cst_63 {dimension_numbers = #tpu.dot_dimension_numbers<[1], [0], [0], [1], [0, 0, 1, 1], [], []>} : vector<2x8xf32>, vector<8x32xf32>, vector<2x32xf32> -> vector<2x32xf32>
    %c0_64 = arith.constant 0 : index
    %c0_65 = arith.constant 0 : index
    %80 = vector.load %arg10[%c0_64, %c0_65] : memref<1x32xf32, #tpu.memory_space<vmem>>, vector<1x32xf32>
    %81 = vector.broadcast %80 : vector<1x32xf32> to vector<2x32xf32>
    %82 = arith.addf %79, %81 : vector<2x32xf32>
    %cst_66 = arith.constant 0.000000e+00 : f32
    %83 = vector.broadcast %cst_66 : f32 to vector<2x32xf32>
    %84 = arith.maximumf %82, %83 : vector<2x32xf32>
    %c0_67 = arith.constant 0 : index
    %c0_68 = arith.constant 0 : index
    %85 = vector.load %arg11[%c0_67, %c0_68] : memref<32x64xf32, #tpu.memory_space<vmem>>, vector<32x64xf32>
    %cst_69 = arith.constant dense<0.000000e+00> : vector<2x64xf32>
    %86 = tpu.matmul %68, %85, %cst_69 {dimension_numbers = #tpu.dot_dimension_numbers<[1], [0], [0], [1], [0, 0, 1, 1], [], []>} : vector<2x32xf32>, vector<32x64xf32>, vector<2x64xf32> -> vector<2x64xf32>
    %c0_70 = arith.constant 0 : index
    %c0_71 = arith.constant 0 : index
    %87 = vector.load %arg12[%c0_70, %c0_71] : memref<32x64xf32, #tpu.memory_space<vmem>>, vector<32x64xf32>
    %cst_72 = arith.constant dense<0.000000e+00> : vector<2x64xf32>
    %88 = tpu.matmul %76, %87, %cst_72 {dimension_numbers = #tpu.dot_dimension_numbers<[1], [0], [0], [1], [0, 0, 1, 1], [], []>} : vector<2x32xf32>, vector<32x64xf32>, vector<2x64xf32> -> vector<2x64xf32>
    %89 = arith.addf %86, %88 : vector<2x64xf32>
    %c0_73 = arith.constant 0 : index
    %c0_74 = arith.constant 0 : index
    %90 = vector.load %arg13[%c0_73, %c0_74] : memref<32x64xf32, #tpu.memory_space<vmem>>, vector<32x64xf32>
    %cst_75 = arith.constant dense<0.000000e+00> : vector<2x64xf32>
    %91 = tpu.matmul %84, %90, %cst_75 {dimension_numbers = #tpu.dot_dimension_numbers<[1], [0], [0], [1], [0, 0, 1, 1], [], []>} : vector<2x32xf32>, vector<32x64xf32>, vector<2x64xf32> -> vector<2x64xf32>
    %92 = arith.addf %89, %91 : vector<2x64xf32>
    %c0_76 = arith.constant 0 : index
    %c0_77 = arith.constant 0 : index
    %93 = vector.load %arg14[%c0_76, %c0_77] : memref<1x64xf32, #tpu.memory_space<vmem>>, vector<1x64xf32>
    %94 = vector.broadcast %93 : vector<1x64xf32> to vector<2x64xf32>
    %95 = arith.addf %92, %94 : vector<2x64xf32>
    %cst_78 = arith.constant 0.000000e+00 : f32
    %96 = vector.broadcast %cst_78 : f32 to vector<2x64xf32>
    %97 = arith.maximumf %95, %96 : vector<2x64xf32>
    %c0_79 = arith.constant 0 : index
    %c0_80 = arith.constant 0 : index
    %98 = vector.load %arg15[%c0_79, %c0_80] : memref<64x6xf32, #tpu.memory_space<vmem>>, vector<64x6xf32>
    %cst_81 = arith.constant dense<0.000000e+00> : vector<2x6xf32>
    %99 = tpu.matmul %97, %98, %cst_81 {dimension_numbers = #tpu.dot_dimension_numbers<[1], [0], [0], [1], [0, 0, 1, 1], [], []>} : vector<2x64xf32>, vector<64x6xf32>, vector<2x6xf32> -> vector<2x6xf32>
    %c0_82 = arith.constant 0 : index
    %c0_83 = arith.constant 0 : index
    %100 = vector.load %arg16[%c0_82, %c0_83] : memref<1x6xf32, #tpu.memory_space<vmem>>, vector<1x6xf32>
    %101 = vector.broadcast %100 : vector<1x6xf32> to vector<2x6xf32>
    %102 = arith.addf %99, %101 : vector<2x6xf32>
    %cst_84 = arith.constant dense<0xFF800000> : vector<2xf32>
    %103 = vector.multi_reduction <maximumf>, %102, %cst_84 [1] : vector<2x6xf32> to vector<2xf32>
    %104 = vector.shape_cast %103 : vector<2xf32> to vector<2x1xf32>
    %105 = vector.broadcast %104 : vector<2x1xf32> to vector<2x6xf32>
    %106 = arith.subf %102, %105 : vector<2x6xf32>
    %107 = math.exp %106 : vector<2x6xf32>
    %cst_85 = arith.constant dense<0.000000e+00> : vector<2xf32>
    %108 = vector.multi_reduction <add>, %107, %cst_85 [1] : vector<2x6xf32> to vector<2xf32>
    %109 = vector.shape_cast %108 : vector<2xf32> to vector<2x1xf32>
    %110 = vector.broadcast %109 : vector<2x1xf32> to vector<2x6xf32>
    %111 = arith.divf %107, %110 : vector<2x6xf32>
    %c0_86 = arith.constant 0 : index
    %c0_87 = arith.constant 0 : index
    %112 = vector.load %arg17[%c0_86, %c0_87] : memref<2x6xf32, #tpu.memory_space<vmem>>, vector<2x6xf32>
    tpu.vector_store %arg17[%c0_86, %c0_87], %111 {strides = array<i32>} : memref<2x6xf32, #tpu.memory_space<vmem>>, vector<2x6xf32>,
    return
  }
  func.func @transform_0(%arg0: i32) -> (i32, i32, i32) {
    %c0_i32 = arith.constant 0 : i32
    %c0_i32_0 = arith.constant 0 : i32
    %c0_i32_1 = arith.constant 0 : i32
    return %arg0, %c0_i32, %c0_i32_0 : i32, i32, i32
  }
  func.func @transform_1(%arg0: i32) -> (i32, i32) {
    %c0_i32 = arith.constant 0 : i32
    %c0_i32_0 = arith.constant 0 : i32
    return %arg0, %c0_i32 : i32, i32
  }
  func.func @transform_2(%arg0: i32) -> (i32, i32) {
    %c0_i32 = arith.constant 0 : i32
    %c0_i32_0 = arith.constant 0 : i32
    return %arg0, %c0_i32 : i32, i32
  }
  func.func @transform_3(%arg0: i32) -> (i32, i32) {
    %c0_i32 = arith.constant 0 : i32
    %c0_i32_0 = arith.constant 0 : i32
    %c0_i32_1 = arith.constant 0 : i32
    return %c0_i32, %c0_i32_0 : i32, i32
  }
  func.func @transform_4(%arg0: i32) -> (i32, i32) {
    %c0_i32 = arith.constant 0 : i32
    %c0_i32_0 = arith.constant 0 : i32
    %c0_i32_1 = arith.constant 0 : i32
    return %c0_i32, %c0_i32_0 : i32, i32
  }
  func.func @transform_5(%arg0: i32) -> (i32, i32) {
    %c0_i32 = arith.constant 0 : i32
    %c0_i32_0 = arith.constant 0 : i32
    %c0_i32_1 = arith.constant 0 : i32
    return %c0_i32, %c0_i32_0 : i32, i32
  }
  func.func @transform_6(%arg0: i32) -> (i32, i32) {
    %c0_i32 = arith.constant 0 : i32
    %c0_i32_0 = arith.constant 0 : i32
    %c0_i32_1 = arith.constant 0 : i32
    return %c0_i32, %c0_i32_0 : i32, i32
  }
  func.func @transform_7(%arg0: i32) -> (i32, i32) {
    %c0_i32 = arith.constant 0 : i32
    %c0_i32_0 = arith.constant 0 : i32
    %c0_i32_1 = arith.constant 0 : i32
    return %c0_i32, %c0_i32_0 : i32, i32
  }
  func.func @transform_8(%arg0: i32) -> (i32, i32) {
    %c0_i32 = arith.constant 0 : i32
    %c0_i32_0 = arith.constant 0 : i32
    %c0_i32_1 = arith.constant 0 : i32
    return %c0_i32, %c0_i32_0 : i32, i32
  }
  func.func @transform_9(%arg0: i32) -> (i32, i32) {
    %c0_i32 = arith.constant 0 : i32
    %c0_i32_0 = arith.constant 0 : i32
    %c0_i32_1 = arith.constant 0 : i32
    return %c0_i32, %c0_i32_0 : i32, i32
  }
  func.func @transform_10(%arg0: i32) -> (i32, i32) {
    %c0_i32 = arith.constant 0 : i32
    %c0_i32_0 = arith.constant 0 : i32
    %c0_i32_1 = arith.constant 0 : i32
    return %c0_i32, %c0_i32_0 : i32, i32
  }
  func.func @transform_11(%arg0: i32) -> (i32, i32) {
    %c0_i32 = arith.constant 0 : i32
    %c0_i32_0 = arith.constant 0 : i32
    %c0_i32_1 = arith.constant 0 : i32
    return %c0_i32, %c0_i32_0 : i32, i32
  }
  func.func @transform_12(%arg0: i32) -> (i32, i32) {
    %c0_i32 = arith.constant 0 : i32
    %c0_i32_0 = arith.constant 0 : i32
    %c0_i32_1 = arith.constant 0 : i32
    return %c0_i32, %c0_i32_0 : i32, i32
  }
  func.func @transform_13(%arg0: i32) -> (i32, i32) {
    %c0_i32 = arith.constant 0 : i32
    %c0_i32_0 = arith.constant 0 : i32
    %c0_i32_1 = arith.constant 0 : i32
    return %c0_i32, %c0_i32_0 : i32, i32
  }
  func.func @transform_14(%arg0: i32) -> (i32, i32) {
    %c0_i32 = arith.constant 0 : i32
    %c0_i32_0 = arith.constant 0 : i32
    %c0_i32_1 = arith.constant 0 : i32
    return %c0_i32, %c0_i32_0 : i32, i32
  }
  func.func @transform_15(%arg0: i32) -> (i32, i32) {
    %c0_i32 = arith.constant 0 : i32
    %c0_i32_0 = arith.constant 0 : i32
    %c0_i32_1 = arith.constant 0 : i32
    return %c0_i32, %c0_i32_0 : i32, i32
  }
  func.func @transform_16(%arg0: i32) -> (i32, i32) {
    %c0_i32 = arith.constant 0 : i32
    %c0_i32_0 = arith.constant 0 : i32
    return %arg0, %c0_i32 : i32, i32
  }
}

</mosaic_0001>

<bundles_post_ra>
// kernel: food_network_forward.1
= control target key start
LH: loop header
LB: loop body
LE: loop exit
PB: predicated region body
PF: predicated region fallthrough
CT: control target
= control target key end

     0   :  { %s5183_s0 = inlined_call_operand.vmem [shape: f32[1,4,686], index: 0, kind: input, shape index: {}]   ;;  %s5184_s1 = inlined_call_operand.vmem [shape: f32[2,8], index: 1, kind: input, shape index: {}]   ;;  %s5185_s2 = inlined_call_operand.vmem [shape: f32[2,8], index: 2, kind: input, shape index: {}]   ;;  %s5186_s3 = inlined_call_operand.vmem [shape: bf16[8,37], index: 3, kind: input, shape index: {}]   ;;  %s5187_s4 = inlined_call_operand.vmem [shape: bf16[2592,32], index: 4, kind: input, shape index: {}]   ;;  %s5188_s5 = inlined_call_operand.vmem [shape: f32[1,32], index: 5, kind: input, shape index: {}]   ;;  %s5189_s6 = inlined_call_operand.vmem [shape: f32[8,32], index: 6, kind: input, shape index: {}]   ;;  %s5190_s7 = inlined_call_operand.vmem [shape: f32[1,32], index: 7, kind: input, shape index: {}]   ;;  %s5191_s8 = inlined_call_operand.vmem [shape: f32[8,32], index: 8, kind: input, shape index: {}]   ;;  %s5192_s9 = inlined_call_operand.vmem [shape: f32[1,32], index: 9, kind: input, shape index: {}]   ;;  %s5193_s10 = inlined_call_operand.vmem [shape: f32[32,64], index: 10, kind: input, shape index: {}]   ;;  %s5194_s11 = inlined_call_operand.vmem [shape: f32[32,64], index: 11, kind: input, shape index: {}]   ;;  %s5195_s12 = inlined_call_operand.vmem [shape: f32[32,64], index: 12, kind: input, shape index: {}]   ;;  %s5196_s13 = inlined_call_operand.vmem [shape: f32[1,64], index: 13, kind: input, shape index: {}]   ;;  %s5197_s14 = inlined_call_operand.vmem [shape: f32[64,6], index: 14, kind: input, shape index: {}]   ;;  %s5198_s15 = inlined_call_operand.vmem [shape: f32[1,6], index: 15, kind: input, shape index: {}]   ;;  %s5199_s16 = inlined_call_operand.hbm [shape: f32[2,6], index: 16, kind: output, shape index: {}]  }
   0x1   :  { %5201 = sst [smem:[#allocation7_spill]] %s5183_s0 }
   0x2   :  { %s5202_s23 = sld [smem:[#allocation7_spill]]  ;;  %s3973_s28 = smov 127   ;;  %v318_v7 = vlaneseq  ;;  %v3980_v8 = vmov 1.0   ;;  %vm72_vm1 = vcmask 60416   ;;  %v3982_v11 = vmov 0  }
   0x3   :  { %s3974_s29 = smov 126   ;;  %s3975_s30 = smov 110   ;;  %432 = vmatprep.mubr.bf16.mxu0 %v3982_v11  ;;  %473 = vmatprep.mubr.bf16.mxu1 %v3982_v11 }
   0x4   :  { %s3976_s0 = smov 109   ;;  %s3977_s17 = smov 108   ;;  %vm320_vm0 = vcmp.lt.s32.totalorder %v318_v7, 648 }
   0x5   :  { %s3978_s18 = smov 92   ;;  %s3979_s19 = smov 91   ;;  %323 = vst.msk [vmem:[#allocation2 + $0xc4] ss:$8 sm:$0xf] %vm320_vm0, %v3980_v8 }
   0x6   :  { %324 = vst.msk [vmem:[#allocation2 + $0xc4] ss:$8 sm:$0x30] %vm320_vm0, %v3980_v8  ;;  %s3981_s20 = smov 90  }
   0x8   :  { %v55_v0 = vld [vmem:[%s5202_s23] sm:$0xff]  ;;  %v4088_v1 = vld [vmem:[%s5202_s23 + $0x8] sm:$0xff]  ;;  %v4093_v2 = vld [vmem:[%s5202_s23 + $0x10] sm:$0xff] }
   0x9   :  { %79 = vrot.lane.b32.xlu0 %v55_v0, %s3973_s28  ;;  %67 = vst [vmem:[#allocation2] sm:$0xf] %v55_v0  ;;  %v61_v3 = vcombine.high %v55_v0, %v55_v0  ;;  %v75_v4 = vcombine.low %v4088_v1, %v4088_v1  ;;  %69 = vst [vmem:[#allocation2 + $0x10] sm:$0xf] %v4088_v1  ;;  %v4102_v5 = vcombine.high %v4088_v1, %v4088_v1 }
   0xa   :  { %71 = vst [vmem:[#allocation2 + $0x20] sm:$0xf] %v4093_v2  ;;  %v74_v6 = vcombine.low %v55_v0, %v55_v0  ;;  %v76_v9 = vcombine.low %v4093_v2, %v4093_v2  ;;  %v63_v10 = vcombine.high %v4093_v2, %v4093_v2 }
   0xb   :  { %110 = vrot.lane.b32.xlu1 %v61_v3, %s3974_s29  ;;  %68 = vst [vmem:[#allocation2 + $0x8] sm:$0xf] %v61_v3  ;;  %70 = vst [vmem:[#allocation2 + $0x18] sm:$0xf] %v4102_v5 }
   0xc   :  { %73 = vst.msk [vmem:[#allocation2 + $0x28] sm:$0xf] %vm72_vm1, %v63_v10 }
   0xd   :  { %81 = vrot.lane.b32.xlu0 %v75_v4, %s3973_s28 }
   0xf   :  { %112 = vrot.lane.b32.xlu1 %v4088_v1, %s3974_s29 }
  0x11   :  { %140 = vrot.lane.b32.xlu0 %v55_v0, %s3975_s30 }
  0x13   :  { %142 = vrot.lane.b32.xlu1 %v75_v4, %s3975_s30 }
  0x15   :  { %77 = vrot.lane.b32.xlu0 %v74_v6, %s3973_s28 }
  0x17   :  { %108 = vrot.lane.b32.xlu1 %v55_v0, %s3974_s29 }
  0x19   :  { %138 = vrot.lane.b32.xlu0 %v74_v6, %s3975_s30 }
  0x1b   :  { %170 = vrot.lane.b32.xlu1 %v61_v3, %s3976_s0 }
  0x1d   :  { %172 = vrot.lane.b32.xlu0 %v4088_v1, %s3976_s0 }
  0x1f   :  { %200 = vrot.lane.b32.xlu1 %v55_v0, %s3977_s17 }
  0x21   :  { %202 = vrot.lane.b32.xlu0 %v75_v4, %s3977_s17 }
  0x23   :  { %230 = vrot.lane.b32.xlu1 %v61_v3, %s3978_s18 }
  0x25   :  { %232 = vrot.lane.b32.xlu0 %v4088_v1, %s3978_s18 }
  0x27   :  { %260 = vrot.lane.b32.xlu1 %v55_v0, %s3979_s19 }
  0x29   :  { %262 = vrot.lane.b32.xlu0 %v75_v4, %s3979_s19 }
  0x2b   :  { %168 = vrot.lane.b32.xlu1 %v55_v0, %s3976_s0 }
  0x2d   :  { %198 = vrot.lane.b32.xlu0 %v74_v6, %s3977_s17 }
  0x2f   :  { %228 = vrot.lane.b32.xlu1 %v55_v0, %s3978_s18 }
  0x31   :  { %258 = vrot.lane.b32.xlu0 %v74_v6, %s3979_s19 }
  0x33   :  { %290 = vrot.lane.b32.xlu1 %v61_v3, %s3981_s20 }
  0x35   :  { %292 = vrot.lane.b32.xlu0 %v4088_v1, %s3981_s20 }
  0x37   :  { %288 = vrot.lane.b32.xlu1 %v55_v0, %s3981_s20 }
  0x39   :  { %83 = vrot.lane.b32.xlu0 %v4088_v1, %s3973_s28 }
  0x3b   :  { %85 = vrot.lane.b32.xlu1 %v76_v9, %s3973_s28 }
  0x3d   :  { %114 = vrot.lane.b32.xlu0 %v4102_v5, %s3974_s29 }
  0x3f   :  { %116 = vrot.lane.b32.xlu1 %v4093_v2, %s3974_s29 }
  0x41   :  { %144 = vrot.lane.b32.xlu0 %v4088_v1, %s3975_s30 }
  0x43   :  { %146 = vrot.lane.b32.xlu1 %v76_v9, %s3975_s30 }
  0x45   :  { %87 = vrot.lane.b32.xlu0 %v4093_v2, %s3973_s28 }
  0x47   :  { %118 = vrot.lane.b32.xlu1 %v63_v10, %s3974_s29 }
  0x49   :  { %148 = vrot.lane.b32.xlu0 %v4093_v2, %s3975_s30 }
  0x4b   :  { %174 = vrot.lane.b32.xlu1 %v4102_v5, %s3976_s0 }
  0x4d   :  { %176 = vrot.lane.b32.xlu0 %v4093_v2, %s3976_s0 }
  0x4f   :  { %204 = vrot.lane.b32.xlu1 %v4088_v1, %s3977_s17 }
  0x51   :  { %206 = vrot.lane.b32.xlu0 %v76_v9, %s3977_s17 }
  0x53   :  { %234 = vrot.lane.b32.xlu1 %v4102_v5, %s3978_s18 }
  0x55   :  { %236 = vrot.lane.b32.xlu0 %v4093_v2, %s3978_s18 }
  0x57   :  { %264 = vrot.lane.b32.xlu1 %v4088_v1, %s3979_s19 }
  0x59   :  { %266 = vrot.lane.b32.xlu0 %v76_v9, %s3979_s19 }
  0x5b   :  { %178 = vrot.lane.b32.xlu1 %v63_v10, %s3976_s0 }
  0x5d   :  { %208 = vrot.lane.b32.xlu0 %v4093_v2, %s3977_s17 }
  0x5f   :  { %238 = vrot.lane.b32.xlu1 %v63_v10, %s3978_s18 }
  0x61   :  { %268 = vrot.lane.b32.xlu0 %v4093_v2, %s3979_s19 }
  0x63   :  { %294 = vrot.lane.b32.xlu1 %v4102_v5, %s3981_s20 }
  0x65   :  { %296 = vrot.lane.b32.xlu0 %v4093_v2, %s3981_s20 }
  0x67   :  { %298 = vrot.lane.b32.xlu1 %v63_v10, %s3981_s20 }
  0x7b   :  { %v80_v12 = vpop.permute.xlu0 %79 }
  0x7c   :  { %21 = vsyncpa [#allocation5], 0  ;;  %vm89_vm2 = vcmask 1039360   ;;  %vm120_vm3 = vcmask 1031168   ;;  %vm150_vm4 = vcmask 900096   ;;  %vm180_vm5 = vcmask 891904  }
  0x7d   :  { %v111_v13 = vpop.permute.xlu1 %110  ;;  %vm210_vm6 = vcmask 883712   ;;  %vm240_vm7 = vcmask 752640   ;;  %vm270_vm8 = vcmask 744448   ;;  %vm300_vm9 = vcmask 736256   ;;  %s3985_s25 = smov 68   ;;  %s3986_s20 = smov 60  }
  0x7e   :  { %vm378_vm10 = vcmask 1041408   ;;  %vm379_vm11 = vcmask 1042432   ;;  %v3983_v3 = vmov 65535   ;;  %vm106_vm12 = vcmask 64516   ;;  %s3987_s29 = smov 8   ;;  %s3988_s19 = smov 76  }
  0x7f   :  { %v4180_v14 = vpop.permute.xlu0 %81  ;;  %v380_v4 = vsel %vm378_vm10, 4294967295, %v3983_v3  ;;  %vm374_vm13 = vcmask 302080   ;;  %vm4346_vm14 = vcmp.lt.s32.totalorder %v318_v7, 324  ;;  %s3990_s21 = smov 84   ;;  %s3991_s22 = smov 24   ;;  %vm4429_vm15 = vcmp.ge.s32.totalorder %v318_v7, 68 }
  0x80   :  { %v91_v15 = vsel %vm89_vm2, %v80_v12, %v4180_v14  ;;  %v4225_v10 = vsel %vm379_vm11, %v380_v4, 0  ;;  %vm4434_vm0 = vcmp.lt.s32.totalorder %v318_v7, 392  ;;  %vm4470_vm10 = vcmp.lt.s32.totalorder %v318_v7, 400 }
  0x81   :  { %102 = vst [vmem:[#allocation2 + $0x8] sm:$0xf0] %v91_v15  ;;  %v4184_v16 = vpop.permute.xlu1 %112 }
  0x82   :  { %v122_v17 = vsel %vm120_vm3, %v111_v13, %v4184_v16 }
  0x83   :  { %133 = vst [vmem:[#allocation2 + $0x38] sm:$0xf] %v122_v17  ;;  %v141_v18 = vpop.permute.xlu0 %140 }
  0x85   :  { %v4188_v19 = vpop.permute.xlu1 %142 }
  0x86   :  { %v152_v20 = vsel %vm150_vm4, %v141_v18, %v4188_v19 }
  0x87   :  { %163 = vst [vmem:[#allocation2 + $0x38] sm:$0xf0] %v152_v20  ;;  %v78_v21 = vpop.permute.xlu0 %77 }
  0x88   :  { %v90_v22 = vsel %vm89_vm2, %v78_v21, %v80_v12  ;;  %v327_v28 = vld [vmem:[#allocation2 + $0x8] sm:$0xff] }
  0x89   :  { %101 = vst [vmem:[#allocation2] sm:$0xf0] %v90_v22  ;;  %v109_v23 = vpop.permute.xlu1 %108 }
  0x8a   :  { %v121_v24 = vsel %vm120_vm3, %v109_v23, %v111_v13 }
  0x8b   :  { %132 = vst [vmem:[#allocation2 + $0x30] sm:$0xf] %v121_v24  ;;  %v139_v25 = vpop.permute.xlu0 %138 }
  0x8c   :  { %v151_v26 = vsel %vm150_vm4, %v139_v25, %v141_v18  ;;  %v4236_v25 = vld [vmem:[%s5186_s3] sm:$0xf] }
  0x8d   :  { %162 = vst [vmem:[#allocation2 + $0x30] sm:$0xf0] %v151_v26  ;;  %v171_v27 = vpop.permute.xlu1 %170 }
  0x8e   :  { %v333_v29 = vld [vmem:[#allocation2 + $0x38] sm:$0xff] }
  0x8f   :  { %v4195_v30 = vpop.permute.xlu0 %172  ;;  %v357_v31 = vpack.c.bf16 %v333_v29, %v327_v28 }
  0x90   :  { %v182_v32 = vsel %vm180_vm5, %v171_v27, %v4195_v30  ;;  %v326_v36 = vld [vmem:[#allocation2] sm:$0xff] }
  0x91   :  { %193 = vst [vmem:[#allocation2 + $0x68] sm:$0xf] %v182_v32  ;;  %v201_v33 = vpop.permute.xlu1 %200  ;;  %400 = vmatprep.subr.bf16.mxu0 %v357_v31 }
  0x93   :  { %v4199_v34 = vpop.permute.xlu0 %202 }
  0x94   :  { %v212_v35 = vsel %vm210_vm6, %v201_v33, %v4199_v34  ;;  %v332_v37 = vld [vmem:[#allocation2 + $0x30] sm:$0xff] }
  0x95   :  { %223 = vst [vmem:[#allocation2 + $0x68] sm:$0xf0] %v212_v35  ;;  %v231_v38 = vpop.permute.xlu1 %230  ;;  %v356_v39 = vpack.c.bf16 %v332_v37, %v326_v36 }
  0x97   :  { %v4203_v40 = vpop.permute.xlu0 %232  ;;  %401 = vmatpush1.bf16.msra.mxu0 %v356_v39 }
  0x98   :  { %v242_v41 = vsel %vm240_vm7, %v231_v38, %v4203_v40 }
  0x99   :  { %253 = vst [vmem:[#allocation2 + $0x98] sm:$0xf] %v242_v41  ;;  %v261_v42 = vpop.permute.xlu1 %260 }
  0x9b   :  { %v4207_v43 = vpop.permute.xlu0 %262 }
  0x9c   :  { %v272_v44 = vsel %vm270_vm8, %v261_v42, %v4207_v43  ;;  %v339_v53 = vld [vmem:[#allocation2 + $0x68] sm:$0xff] }
  0x9d   :  { %283 = vst [vmem:[#allocation2 + $0x98] sm:$0xf0] %v272_v44  ;;  %v169_v45 = vpop.permute.xlu1 %168 }
  0x9e   :  { %v181_v46 = vsel %vm180_vm5, %v169_v45, %v171_v27 }
  0x9f   :  { %192 = vst [vmem:[#allocation2 + $0x60] sm:$0xf] %v181_v46  ;;  %v199_v47 = vpop.permute.xlu0 %198 }
  0xa0   :  { %v211_v48 = vsel %vm210_vm6, %v199_v47, %v201_v33 }
  0xa1   :  { %222 = vst [vmem:[#allocation2 + $0x60] sm:$0xf0] %v211_v48  ;;  %v229_v49 = vpop.permute.xlu1 %228 }
  0xa2   :  { %v241_v50 = vsel %vm240_vm7, %v229_v49, %v231_v38 }
  0xa3   :  { %252 = vst [vmem:[#allocation2 + $0x90] sm:$0xf] %v241_v50  ;;  %v259_v51 = vpop.permute.xlu0 %258 }
  0xa4   :  { %v271_v52 = vsel %vm270_vm8, %v259_v51, %v261_v42  ;;  %v345_v54 = vld [vmem:[#allocation2 + $0x98] sm:$0xff] }
  0xa5   :  { %282 = vst [vmem:[#allocation2 + $0x90] sm:$0xf0] %v271_v52  ;;  %v291_v55 = vpop.permute.xlu1 %290  ;;  %v363_v56 = vpack.c.bf16 %v345_v54, %v339_v53 }
  0xa7   :  { %v4215_v57 = vpop.permute.xlu0 %292  ;;  %402 = vmatprep.subr.bf16.mxu0 %v363_v56 }
  0xa8   :  { %v302_v58 = vsel %vm300_vm9, %v291_v55, %v4215_v57  ;;  %v338_v63 = vld [vmem:[#allocation2 + $0x60] sm:$0xff] }
  0xa9   :  { %313 = vst [vmem:[#allocation2 + $0xc8] sm:$0xf] %v302_v58  ;;  %v289_v59 = vpop.permute.xlu1 %288 }
  0xaa   :  { %v301_v60 = vsel %vm300_vm9, %v289_v59, %v291_v55 }
  0xab   :  { %312 = vst [vmem:[#allocation2 + $0xc0] sm:$0xf] %v301_v60  ;;  %v84_v61 = vpop.permute.xlu0 %83 }
  0xac   :  { %v92_v62 = vsel %vm89_vm2, %v4180_v14, %v84_v61  ;;  %v344_v0 = vld [vmem:[#allocation2 + $0x90] sm:$0xff] }
  0xad   :  { %103 = vst [vmem:[#allocation2 + $0x10] sm:$0xf0] %v92_v62  ;;  %v86_v1 = vpop.permute.xlu1 %85  ;;  %v362_v2 = vpack.c.bf16 %v344_v0, %v338_v63 }
  0xae   :  { %v93_v5 = vsel %vm89_vm2, %v84_v61, %v86_v1 }
  0xaf   :  { %104 = vst [vmem:[#allocation2 + $0x18] sm:$0xf0] %v93_v5  ;;  %v115_v6 = vpop.permute.xlu0 %114  ;;  %403 = vmatpush1.bf16.msra.mxu0 %v362_v2 }
  0xb0   :  { %v123_v8 = vsel %vm120_vm3, %v4184_v16, %v115_v6  ;;  %v351_v9 = vld [vmem:[#allocation2 + $0xc8] sm:$0x1f] }
  0xb1   :  { %134 = vst [vmem:[#allocation2 + $0x40] sm:$0xf] %v123_v8  ;;  %v117_v12 = vpop.permute.xlu1 %116  ;;  %v369_v13 = vpack.c.bf16 %v351_v9, %v351_v9 }
  0xb2   :  { %v124_v14 = vsel %vm120_vm3, %v115_v6, %v117_v12  ;;  %v350_v15 = vld [vmem:[#allocation2 + $0xc0] sm:$0x1f] }
  0xb3   :  { %135 = vst [vmem:[#allocation2 + $0x48] sm:$0xf] %v124_v14  ;;  %v145_v17 = vpop.permute.xlu0 %144  ;;  %v386_v18 = vand.u32 %v4225_v10, %v369_v13  ;;  %v368_v20 = vpack.c.bf16 %v350_v15, %v350_v15 }
  0xb4   :  { %v153_v21 = vsel %vm150_vm4, %v4188_v19, %v145_v17  ;;  %v328_v39 = vld [vmem:[#allocation2 + $0x10] sm:$0xff] }
  0xb5   :  { %164 = vst [vmem:[#allocation2 + $0x40] sm:$0xf0] %v153_v21  ;;  %v147_v22 = vpop.permute.xlu1 %146  ;;  %404 = vmatprep.subr.bf16.mxu0 %v386_v18  ;;  %v383_v16 = vand.u32 %v4225_v10, %v368_v20 }
  0xb6   :  { %v154_v23 = vsel %vm150_vm4, %v145_v17, %v147_v22  ;;  %v329_v35 = vld [vmem:[#allocation2 + $0x18] sm:$0xff] }
  0xb7   :  { %165 = vst [vmem:[#allocation2 + $0x48] sm:$0xf0] %v154_v23  ;;  %v88_v24 = vpop.permute.xlu0 %87  ;;  %405 = vmatpush1.bf16.msra.mxu0 %v383_v16 }
  0xb8   :  { %v94_v26 = vsel %vm89_vm2, %v86_v1, %v88_v24  ;;  %107 = vst.msk [vmem:[#allocation2 + $0x28] sm:$0xf0] %vm106_vm12, %v88_v24  ;;  %vm610_vm2 = vmand %vm4429_vm15, %vm4434_vm0  ;;  %vm691_vm0 = vcmask 130048  }
  0xb9   :  { %105 = vst [vmem:[#allocation2 + $0x20] sm:$0xf0] %v94_v26  ;;  %v119_v19 = vpop.permute.xlu1 %118 }
  0xba   :  { %v125_v27 = vsel %vm120_vm3, %v117_v12, %v119_v19  ;;  %137 = vst.msk [vmem:[#allocation2 + $0x58] sm:$0xf] %vm72_vm1, %v119_v19  ;;  %3220 = vmatmul.mubr.msk.bf16.vlgmr.msra.gmra.mrb[0].mxu0 %vm374_vm13, %v4236_v25  ;;  %vm589_vm3 = vcmask 490496  }
  0xbb   :  { %136 = vst [vmem:[#allocation2 + $0x50] sm:$0xf] %v125_v27  ;;  %v149_v28 = vpop.permute.xlu0 %148  ;;  %514 = vmatprep.mubr.bf16.mxu0 %v3982_v11 }
  0xbc   :  { %v155_v29 = vsel %vm150_vm4, %v147_v22, %v149_v28  ;;  %167 = vst.msk [vmem:[#allocation2 + $0x58] sm:$0xf0] %vm106_vm12, %v149_v28  ;;  %v334_v32 = vld [vmem:[#allocation2 + $0x40] sm:$0xff]  ;;  %vm4449_vm4 = vcmp.ge.s32.totalorder %v318_v7, 8 }
  0xbd   :  { %166 = vst [vmem:[#allocation2 + $0x50] sm:$0xf0] %v155_v29  ;;  %v175_v31 = vpop.permute.xlu1 %174  ;;  %v358_v42 = vpack.c.bf16 %v334_v32, %v328_v39  ;;  %v3782_v39 = vld [vmem:[%s5187_s4 + $0x80] sm:$0xff]  }
  0xbe   :  { %v183_v33 = vsel %vm180_vm5, %v4195_v30, %v175_v31  ;;  %v335_v36 = vld [vmem:[#allocation2 + $0x48] sm:$0xff] }
  0xbf   :  { %194 = vst [vmem:[#allocation2 + $0x70] sm:$0xf] %v183_v33  ;;  %v177_v37 = vpop.permute.xlu0 %176  ;;  %v359_v38 = vpack.c.bf16 %v335_v36, %v329_v35  ;;  %v331_v46 = vld [vmem:[#allocation2 + $0x28] sm:$0xff] }
  0xc0   :  { %v184_v41 = vsel %vm180_vm5, %v175_v31, %v177_v37  ;;  %v330_v49 = vld [vmem:[#allocation2 + $0x20] sm:$0xff] }
  0xc1   :  { %195 = vst [vmem:[#allocation2 + $0x78] sm:$0xf] %v184_v41  ;;  %441 = vmatprep.subr.bf16.mxu1 %v359_v38  ;;  %v205_v11 = vpop.permute.xlu1 %204  ;;  %v3780_v38 = vld [vmem:[%s5187_s4] sm:$0xff]   ;;  %v3785_v41 = vld [vmem:[%s5187_s4 + $0xc8] sm:$0xff]  }
  0xc2   :  { %v213_v44 = vsel %vm210_vm6, %v4199_v34, %v205_v11  ;;  %442 = vmatpush1.bf16.msra.mxu1 %v358_v42  ;;  %v3784_v42 = vld [vmem:[%s5187_s4 + $0x8] sm:$0xff]  }
  0xc3   :  { %224 = vst [vmem:[#allocation2 + $0x70] sm:$0xf0] %v213_v44  ;;  %v207_v45 = vpop.permute.xlu0 %206  ;;  %v337_v30 = vld [vmem:[#allocation2 + $0x58] sm:$0xff]  ;;  %v3787_v44 = vld [vmem:[%s5187_s4 + $0x50] sm:$0xff]  }
  0xc4   :  { %v214_v47 = vsel %vm210_vm6, %v205_v11, %v207_v45  ;;  %v361_v48 = vpack.c.bf16 %v337_v30, %v331_v46  ;;  %v336_v50 = vld [vmem:[#allocation2 + $0x50] sm:$0xff]  ;;  %v3786_v11 = vld [vmem:[%s5187_s4 + $0x88] sm:$0xff]  }
  0xc5   :  { %225 = vst [vmem:[#allocation2 + $0x78] sm:$0xf0] %v214_v47  ;;  %v235_v51 = vpop.permute.xlu1 %234  ;;  %v360_v52 = vpack.c.bf16 %v336_v50, %v330_v49 }
  0xc6   :  { %v243_v53 = vsel %vm240_vm7, %v4203_v40, %v235_v51  ;;  %482 = vmatprep.subr.bf16.mxu0 %v361_v48 }
  0xc7   :  { %254 = vst [vmem:[#allocation2 + $0xa0] sm:$0xf] %v243_v53  ;;  %v237_v54 = vpop.permute.xlu0 %236  ;;  %483 = vmatpush1.bf16.msra.mxu0 %v360_v52  ;;  %v3984_v53 = vmov 1966171168  }
  0xc8   :  { %v244_v34 = vsel %vm240_vm7, %v235_v51, %v237_v54 }
  0xc9   :  { %255 = vst [vmem:[#allocation2 + $0xa8] sm:$0xf] %v244_v34  ;;  %v265_v55 = vpop.permute.xlu1 %264 }
  0xca   :  { %v273_v56 = vsel %vm270_vm8, %v4207_v43, %v265_v55  ;;  %v340_v8 = vld [vmem:[#allocation2 + $0x70] sm:$0xff] }
  0xcb   :  { %284 = vst [vmem:[#allocation2 + $0xa0] sm:$0xf0] %v273_v56  ;;  %v267_v58 = vpop.permute.xlu0 %266  ;;  %v3789_v56 = vld [vmem:[%s5187_s4 + $0xd0] sm:$0xff]  }
  0xcc   :  { %v274_v59 = vsel %vm270_vm8, %v265_v55, %v267_v58  ;;  %v341_v3 = vld [vmem:[#allocation2 + $0x78] sm:$0xff]  ;;  %v4311_v55 = vshrl.u32 %v318_v7, 7 }
  0xcd   :  { %285 = vst [vmem:[#allocation2 + $0xa8] sm:$0xf0] %v274_v59  ;;  %v179_v60 = vpop.permute.xlu1 %178  ;;  %v3791_v59 = vld [vmem:[%s5187_s4 + $0x58] sm:$0xff]  }
  0xce   :  { %v185_v61 = vsel %vm180_vm5, %v177_v37, %v179_v60  ;;  %197 = vst.msk [vmem:[#allocation2 + $0x88] sm:$0xf] %vm72_vm1, %v179_v60  ;;  %v3779_v37 = vld [vmem:[%s5187_s4 + $0x40] sm:$0xff]   ;;  %v3792_v60 = vld [vmem:[%s5187_s4 + $0x18] sm:$0xff]   ;;  %vm4454_vm5 = vcmp.lt.s32.totalorder %v318_v7, 332 }
  0xcf   :  { %196 = vst [vmem:[#allocation2 + $0x80] sm:$0xf] %v185_v61  ;;  %v209_v40 = vpop.permute.xlu0 %208 }
  0xd0   :  { %v215_v62 = vsel %vm210_vm6, %v207_v45, %v209_v40  ;;  %227 = vst.msk [vmem:[#allocation2 + $0x88] sm:$0xf0] %vm106_vm12, %v209_v40  ;;  %v3788_v45 = vld [vmem:[%s5187_s4 + $0x10] sm:$0xff]   ;;  %v3793_v40 = vld [vmem:[%s5187_s4 + $0xd8] sm:$0xff]   ;;  %vm633_vm6 = vmand %vm4449_vm4, %vm4454_vm5  ;;  %vm741_vm4 = vcmask 687104   ;;  %vm4543_vm5 = vcmp.ge.s32.totalorder %v318_v7, 24 }
  0xd1   :  { %226 = vst [vmem:[#allocation2 + $0x80] sm:$0xf0] %v215_v62  ;;  %v239_v63 = vpop.permute.xlu1 %238 }
  0xd2   :  { %v245_v43 = vsel %vm240_vm7, %v237_v54, %v239_v63  ;;  %257 = vst.msk [vmem:[#allocation2 + $0xb8] sm:$0xf] %vm72_vm1, %v239_v63  ;;  %v346_v1 = vld [vmem:[#allocation2 + $0xa0] sm:$0xff]  ;;  %v534_v54 = vunpack.c.l.s4 %v3984_v53  ;;  %v3794_v63 = vld [vmem:[%s5187_s4 + $0x98] sm:$0xff]  }
  0xd3   :  { %256 = vst [vmem:[#allocation2 + $0xb0] sm:$0xf] %v245_v43  ;;  %v269_v0 = vpop.permute.xlu0 %268  ;;  %v364_v12 = vpack.c.bf16 %v346_v1, %v340_v8  ;;  %v3796_v8 = vld [vmem:[%s5187_s4 + $0x20] sm:$0xff]   ;;  %v3808_v53 = vld [vmem:[%s5187_s4 + $0x38] sm:$0xff]  }
  0xd4   :  { %v275_v2 = vsel %vm270_vm8, %v267_v58, %v269_v0  ;;  %287 = vst.msk [vmem:[#allocation2 + $0xb8] sm:$0xf0] %vm106_vm12, %v269_v0  ;;  %v347_v4 = vld [vmem:[#allocation2 + $0xa8] sm:$0xff]  ;;  %v535_v34 = vunpack.c.0.s8 %v534_v54  ;;  %v3790_v58 = vld [vmem:[%s5187_s4 + $0x90] sm:$0xff]   ;;  %vm628_vm8 = vcmask 64512   ;;  %vm648_vm12 = vcmask 621568  }
  0xd5   :  { %286 = vst [vmem:[#allocation2 + $0xb0] sm:$0xf0] %v275_v2  ;;  %v295_v5 = vpop.permute.xlu1 %294  ;;  %v365_v6 = vpack.c.bf16 %v347_v4, %v341_v3  ;;  %v3795_v2 = vld [vmem:[%s5187_s4 + $0x60] sm:$0xff]  }
  0xd6   :  { %v303_v9 = vsel %vm300_vm9, %v4215_v57, %v295_v5  ;;  %v4326_v61 = vsub.s32 %v535_v34, %v4311_v55  ;;  %v3809_v34 = vld [vmem:[%s5187_s4 + $0xf8] sm:$0xff]  }
  0xd7   :  { %314 = vst [vmem:[#allocation2 + $0xd0] sm:$0xf] %v303_v9  ;;  %v297_v13 = vpop.permute.xlu0 %296  ;;  %443 = vmatprep.subr.bf16.mxu1 %v365_v6  ;;  %v343_v18 = vld [vmem:[#allocation2 + $0x88] sm:$0xff] }
  0xd8   :  { %v304_v14 = vsel %vm300_vm9, %v295_v5, %v297_v13  ;;  %444 = vmatpush1.bf16.msra.mxu1 %v364_v12  ;;  %v342_v22 = vld [vmem:[#allocation2 + $0x80] sm:$0xff] }
  0xd9   :  { %315 = vst [vmem:[#allocation2 + $0xd8] sm:$0xf] %v304_v14  ;;  %v299_v15 = vpop.permute.xlu1 %298 }
  0xda   :  { %v305_v17 = vsel %vm300_vm9, %v297_v13, %v299_v15  ;;  %317 = vst.msk [vmem:[#allocation2 + $0xe8] sm:$0xf] %vm72_vm1, %v299_v15  ;;  %vm605_vm1 = vcmask 556032   ;;  %vm4465_vm9 = vcmp.ge.s32.totalorder %v318_v7, 76 }
  0xdb   :  { %316 = vst [vmem:[#allocation2 + $0xe0] sm:$0xf] %v305_v17  ;;  %v349_v20 = vld [vmem:[#allocation2 + $0xb8] sm:$0xff]  ;;  %vm653_vm11 = vmand %vm4465_vm9, %vm4470_vm10  ;;  %vm768_vm10 = vcmask 195584  }
  0xdc   :  { %v367_v21 = vpack.c.bf16 %v349_v20, %v343_v18  ;;  %v348_v16 = vld [vmem:[#allocation2 + $0xb0] sm:$0xff]  ;;  %v3797_v18 = vld [vmem:[%s5187_s4 + $0xe0] sm:$0xff]  }
  0xdd   :  { %v366_v57 = vpack.c.bf16 %v348_v16, %v342_v22 }
  0xde   :  { %484 = vmatprep.subr.bf16.mxu0 %v367_v21  ;;  %v352_v23 = vld [vmem:[#allocation2 + $0xd0] sm:$0x1f] }
  0xdf   :  { %485 = vmatpush1.bf16.msra.mxu0 %v366_v57  ;;  %v370_v26 = vpack.c.bf16 %v352_v23, %v352_v23  ;;  %v3798_v57 = vld [vmem:[%s5187_s4 + $0xa0] sm:$0xff]  }
  0xe0   :  { %v353_v24 = vld [vmem:[#allocation2 + $0xd8] sm:$0x1f] }
  0xe1   :  { %v371_v19 = vpack.c.bf16 %v353_v24, %v353_v24  ;;  %v355_v27 = vld [vmem:[#allocation2 + $0xe8] sm:$0x1f]  ;;  %v389_v33 = vand.u32 %v4225_v10, %v370_v26 }
  0xe2   :  { %v373_v28 = vpack.c.bf16 %v355_v27, %v355_v27  ;;  %v354_v29 = vld [vmem:[#allocation2 + $0xe0] sm:$0x1f]  ;;  %v3799_v27 = vld [vmem:[%s5187_s4 + $0x68] sm:$0xff]  }
  0xe3   :  { %v392_v31 = vand.u32 %v4225_v10, %v371_v19  ;;  %v372_v32 = vpack.c.bf16 %v354_v29, %v354_v29 }
  0xe4   :  { %v398_v35 = vand.u32 %v4225_v10, %v373_v28 }
  0xe5   :  { %445 = vmatprep.subr.bf16.mxu1 %v392_v31  ;;  %v395_v36 = vand.u32 %v4225_v10, %v372_v32  ;;  %v3781_v10 = vld [vmem:[%s5187_s4 + $0xc0] sm:$0xff]  }
  0xe6   :  { %446 = vmatpush1.bf16.msra.mxu1 %v389_v33  ;;  %486 = vmatprep.subr.bf16.mxu0 %v398_v35  ;;  %v3800_v33 = vld [vmem:[%s5187_s4 + $0x28] sm:$0xff]  }
  0xe7   :  { %487 = vmatpush1.bf16.msra.mxu0 %v395_v36  ;;  %3398 = vmatprep.subr.bf16.mxu1 %v3779_v37 }
  0xe8   :  { %3420 = vmatprep.subr.bf16.mxu0 %v3781_v10  ;;  %v3801_v10 = vld [vmem:[%s5187_s4 + $0xe8] sm:$0xff]  }
  0xe9   :  { %3221 = vmatmul.mubr.msk.bf16.vlgmr.msra.gmra.mrb[0].mxu1 %vm374_vm13, %v4236_v25 }
  0xea   :  { %3222 = vmatmul.mubr.msk.bf16.vlgmr.msra.gmra.mrb[4].mxu0 %vm374_vm13, %v4236_v25  ;;  %v3783_v25 = vld [vmem:[%s5187_s4 + $0x48] sm:$0xff]   ;;  %3399 = vmatpush3.bf16.msra.mxu1 %v3780_v38  ;;  %vm4497_vm13 = vcmp.ge.s32.totalorder %v318_v7, 16 }
  0xeb   :  { %3421 = vmatpush3.bf16.msra.mxu0 %v3782_v39  ;;  %3400 = vmatprep.subr.bf16.mxu1 %v3783_v25 }
  0xec   :  { %3422 = vmatprep.subr.bf16.mxu0 %v3785_v41  ;;  %v3802_v41 = vld [vmem:[%s5187_s4 + $0xa8] sm:$0xff]  }
  0xee   :  { %3401 = vmatpush3.bf16.msra.mxu1 %v3784_v42 }
  0xef   :  { %3423 = vmatpush3.bf16.msra.mxu0 %v3786_v11  ;;  %3402 = vmatprep.subr.bf16.mxu1 %v3787_v44  ;;  %v3803_v44 = vld [vmem:[%s5187_s4 + $0x70] sm:$0xff]  }
  0xf0   :  { %3424 = vmatprep.subr.bf16.mxu0 %v3789_v56  ;;  %v3810_v56 = vld [vmem:[%s5187_s4 + $0xb8] sm:$0xff]  }
  0xf2   :  { %3403 = vmatpush3.bf16.msra.mxu1 %v3788_v45 }
  0xf3   :  { %3425 = vmatpush3.bf16.msra.mxu0 %v3790_v58  ;;  %3404 = vmatprep.subr.bf16.mxu1 %v3791_v59  ;;  %v3811_v59 = vld [vmem:[%s5187_s4 + $0x140] sm:$0xff]  }
  0xf4   :  { %3426 = vmatprep.subr.bf16.mxu0 %v3793_v40  ;;  %v3813_v40 = vld [vmem:[%s5187_s4 + $0x1c0] sm:$0xff]  }
  0xf6   :  { %3405 = vmatpush3.bf16.msra.mxu1 %v3792_v60 }
  0xf7   :  { %3427 = vmatpush3.bf16.msra.mxu0 %v3794_v63  ;;  %3406 = vmatprep.subr.bf16.mxu1 %v3795_v2 }
  0xf8   :  { %3428 = vmatprep.subr.bf16.mxu0 %v3797_v18 }
  0xfa   :  { %3407 = vmatpush3.bf16.msra.mxu1 %v3796_v8 }
  0xfb   :  { %3429 = vmatpush3.bf16.msra.mxu0 %v3798_v57  ;;  %3408 = vmatprep.subr.bf16.mxu1 %v3799_v27 }
  0xfc   :  { %3430 = vmatprep.subr.bf16.mxu0 %v3801_v10 }
  0xfe   :  { %3409 = vmatpush3.bf16.msra.mxu1 %v3800_v33  ;;  %v3825_v33 = vld [vmem:[%s5187_s4 + $0x118] sm:$0xff]  }
  0xff   :  { %3431 = vmatpush3.bf16.msra.mxu0 %v3802_v41  ;;  %3410 = vmatprep.subr.bf16.mxu1 %v3803_v44  ;;  %v3831_v41 = vld [vmem:[%s5187_s4 + $0x1a0] sm:$0xff]  }
 0x18d   :  { %v434_v46 = vpop.f32.mrb[0].mxu0 }
 0x18e   :  { %v523_v30 = vmax.f32 %v434_v46, 0.0  ;;  %v436_v47 = vpop.f32.mrb[1].mxu0 }
 0x18f   :  { %v524_v48 = vmax.f32 %v436_v47, 0.0  ;;  %v438_v49 = vpop.f32.mrb[2].mxu0 }
 0x190   :  { %v439_v50 = vpop.f32.mrb[3].mxu0  ;;  %v3806_v49 = vld [vmem:[%s5187_s4 + $0xb0] sm:$0xff]  }
 0x191   :  { %v532_v51 = vcombine.low %v523_v30, %v524_v48  ;;  %v664_v52 = vcombine.high %v523_v30, %v524_v48  ;;  %v3804_v30 = vld [vmem:[%s5187_s4 + $0x30] sm:$0xff]  }
 0x192   :  { %v3805_v48 = vld [vmem:[%s5187_s4 + $0xf0] sm:$0xff]   ;;  %3411 = vmatpush3.bf16.msra.mxu1 %v3804_v30 }
 0x193   :  { %v539_v9 = vrot.slane %v532_v51, %v4326_v61  ;;  %v4357_v28 = vrot.slane %v664_v52, %v4326_v61  ;;  %3432 = vmatprep.subr.bf16.mxu0 %v3805_v48  ;;  %v3807_v52 = vld [vmem:[%s5187_s4 + $0x78] sm:$0xff]  }
 0x194   :  { %3433 = vmatpush3.bf16.msra.mxu0 %v3806_v49  ;;  %3412 = vmatprep.subr.bf16.mxu1 %v3807_v52  ;;  %v3842_v52 = vld [vmem:[%s5187_s4 + $0x1f8] sm:$0xff]  }
 0x195   :  { %3434 = vmatprep.subr.bf16.mxu0 %v3809_v34 }
 0x196   :  { %3413 = vmatpush3.bf16.msra.mxu1 %v3808_v53 }
 0x197   :  { %3442 = vmatprep.subr.bf16.mxu1 %v3811_v59 }
 0x198   :  { %3435 = vmatpush3.bf16.msra.mxu0 %v3810_v56 }
 0x199   :  { %3464 = vmatprep.subr.bf16.mxu0 %v3813_v40 }
 0x1bc   :  { %v475_v62 = vpop.f32.mrb[0].mxu1 }
 0x1bd   :  { %v525_v43 = vmax.f32 %v475_v62, 0.0  ;;  %v477_v0 = vpop.f32.mrb[1].mxu1  ;;  %v516_v1 = vpop.f32.mrb[4].mxu0 }
 0x1be   :  { %v526_v3 = vmax.f32 %v477_v0, 0.0  ;;  %v527_v4 = vmax.f32 %v516_v1, 0.0  ;;  %v479_v5 = vpop.f32.mrb[2].mxu1  ;;  %v518_v6 = vpop.f32.mrb[5].mxu0 }
 0x1bf   :  { %v665_v12 = vcombine.high %v525_v43, %v525_v43  ;;  %v528_v13 = vmax.f32 %v518_v6, 0.0  ;;  %v480_v14 = vpop.f32.mrb[3].mxu1  ;;  %v520_v15 = vpop.f32.mrb[6].mxu0  ;;  %v546_v17 = vrot.slane %v525_v43, %v4326_v61  ;;  %v3852_v5 = vld [vmem:[%s5187_s4 + $0x288] sm:$0xff]  }
 0x1c0   :  { %v562_v20 = vcombine.low %v525_v43, %v526_v3  ;;  %v699_v21 = vcombine.high %v525_v43, %v526_v3  ;;  %v521_v22 = vpop.f32.mrb[7].mxu0 }
 0x1c1   :  { %v563_v23 = vcombine.low %v527_v4, %v528_v13  ;;  %v700_v24 = vcombine.high %v527_v4, %v528_v13  ;;  %v594_v26 = vcombine.high %v539_v9, %v546_v17  ;;  %v547_v19 = vcombine.low %v539_v9, %v546_v17  ;;  %v3816_v13 = vld [vmem:[%s5187_s4 + $0x108] sm:$0xff]  }
 0x1c2   :  { %v570_v29 = vrot.slane %v562_v20, %v4326_v61  ;;  %v4361_v31 = vrot.slane %v699_v21, %v4326_v61  ;;  %v4364_v32 = vrot.slane %v665_v12, %v4326_v61  ;;  %v3992_v17 = vmov 1983009808  }
 0x1c3   :  { %v577_v35 = vrot.slane %v563_v23, %v4326_v61  ;;  %v714_v36 = vrot.slane %v700_v24, %v4326_v61  ;;  %v601_v37 = vrot.slane %v594_v26, %v4326_v61  ;;  %v554_v38 = vrot.slane %v547_v19, %v4326_v61  ;;  %v3818_v23 = vld [vmem:[%s5187_s4 + $0x188] sm:$0xff]  }
 0x1c4   :  { %v680_v39 = vcombine.low %v4357_v28, %v4364_v32  ;;  %v730_v25 = vcombine.high %v4357_v28, %v4364_v32  ;;  %v817_v18 = vunpack.c.l.s4 %v3992_v17  ;;  %v3819_v17 = vld [vmem:[%s5187_s4 + $0x150] sm:$0xff]  }
 0x1c5   :  { %v613_v42 = vcombine.high %v570_v29, %v577_v35  ;;  %602 = vrot.lane.b32.xlu1 %v601_v37, %s3985_s25  ;;  %v578_v11 = vcombine.low %v570_v29, %v577_v35  ;;  %558 = vst.msk [vmem:[#allocation3] ss:$2 sm:$0x7] %vm4346_vm14, %v554_v38  ;;  %v715_v45 = vcombine.low %v4361_v31, %v714_v36  ;;  %v3823_v32 = vld [vmem:[%s5187_s4 + $0x190] sm:$0xff]  }
 0x1c6   :  { %v749_v46 = vcombine.high %v4361_v31, %v714_v36  ;;  %v624_v54 = vcombine.high %v554_v38, %v554_v38  ;;  %v644_v60 = vcombine.high %v601_v37, %v601_v37  ;;  %v687_v63 = vrot.slane %v680_v39, %v4326_v61 }
 0x1c7   :  { %v585_v47 = vrot.slane %v578_v11, %v4326_v61  ;;  %v4401_v51 = vrot.slane %v613_v42, %v4326_v61  ;;  %v722_v62 = vrot.slane %v715_v45, %v4326_v61  ;;  %v737_v0 = vrot.slane %v730_v25, %v4326_v61 }
 0x1c8   :  { %v756_v43 = vrot.slane %v749_v46, %v4326_v61  ;;  %v764_v2 = vcombine.high %v687_v63, %v687_v63  ;;  %v818_v19 = vunpack.c.0.s8 %v817_v18 }
 0x1c9   :  { %586 = vrot.lane.b32.xlu0 %v585_v47, %s3986_s20  ;;  %v636_v50 = vcombine.high %v585_v47, %v585_v47  ;;  %v656_v58 = vcombine.high %v4401_v51, %v4401_v51  ;;  %s3989_s20 = smov 16   ;;  %v776_v1 = vcombine.high %v722_v62, %v722_v62  ;;  %v784_v4 = vcombine.high %v737_v0, %v737_v0 }
 0x1ca   :  { %v795_v3 = vcombine.high %v756_v43, %v756_v43  ;;  %v4508_v37 = vsub.s32 %v818_v19, %v4311_v55  ;;  %v3820_v19 = vld [vmem:[%s5187_s4 + $0x110] sm:$0xff]   ;;  %v3833_v55 = vld [vmem:[%s5187_s4 + $0x128] sm:$0xff]  }
 0x1cb   :  { %637 = vrot.lane.b32.xlu1 %v636_v50, %s3985_s25 }
 0x1cd   :  { %625 = vrot.lane.b32.xlu0 %v624_v54, %s3987_s29 }
 0x1cf   :  { %657 = vrot.lane.b32.xlu1 %v656_v58, %s3987_s29  ;;  %v3812_v58 = vld [vmem:[%s5187_s4 + $0x100] sm:$0xff]  }
 0x1d1   :  { %645 = vrot.lane.b32.xlu0 %v644_v60, %s3988_s19 }
 0x1d3   :  { %723 = vrot.lane.b32.xlu1 %v722_v62, %s3988_s19  ;;  %v3815_v62 = vld [vmem:[%s5187_s4 + $0x148] sm:$0xff]  }
 0x1d5   :  { %688 = vrot.lane.b32.xlu0 %v687_v63, %s3989_s20 }
 0x1d7   :  { %757 = vrot.lane.b32.xlu1 %v756_v43, %s3989_s20 }
 0x1d9   :  { %738 = vrot.lane.b32.xlu0 %v737_v0, %s3990_s21 }
 0x1db   :  { %777 = vrot.lane.b32.xlu1 %v776_v1, %s3990_s21 }
 0x1dd   :  { %765 = vrot.lane.b32.xlu0 %v764_v2, %s3991_s22 }
 0x1df   :  { %796 = vrot.lane.b32.xlu1 %v795_v3, %s3991_s22 }
 0x1e1   :  { %785 = vrot.lane.b32.xlu0 %v784_v4, %s3978_s18  ;;  %v3814_v4 = vld [vmem:[%s5187_s4 + $0x180] sm:$0xff]  }
 0x237   :  { %v603_v6 = vpop.permute.xlu1 %602 }
 0x238   :  { %v604_v8 = vrot.slane %v603_v6, 7 }
 0x23a   :  { %v606_v9 = vsel %vm605_vm1, %v604_v8, %v603_v6 }
 0x23b   :  { %v587_v12 = vpop.permute.xlu0 %586  ;;  %612 = vst.msk [vmem:[#allocation3 + $0x4] ss:$2 sm:$0xf] %vm610_vm2, %v606_v9 }
 0x23c   :  { %v588_v15 = vrot.slane %v587_v12, 1 }
 0x23d   :  { %v638_v20 = vpop.permute.xlu1 %637 }
 0x23e   :  { %v590_v21 = vsel %vm589_vm3, %v587_v12, %v588_v15  ;;  %v639_v22 = vrot.slane %v638_v20, 1 }
 0x23f   :  { %593 = vst.msk [vmem:[#allocation3 + $0x1] ss:$2 sm:$0x7] %vm4346_vm14, %v590_v21  ;;  %v626_v57 = vpop.permute.xlu0 %625  ;;  %vm4502_vm14 = vcmp.lt.s32.totalorder %v318_v7, 340 }
 0x240   :  { %623 = vst.msk [vmem:[#allocation3 + $0x5] ss:$2 sm:$0xf] %vm610_vm2, %v4401_v51  ;;  %v640_v16 = vsel %vm605_vm1, %v638_v20, %v639_v22  ;;  %v627_v26 = vrot.slane %v626_v57, 7  ;;  %vm696_vm15 = vmand %vm4497_vm13, %vm4502_vm14  ;;  %vm4516_vm1 = vcmp.ge.s32.totalorder %v318_v7, 84  ;;  %vm4521_vm2 = vcmp.lt.s32.totalorder %v318_v7, 408 }
 0x241   :  { %643 = vst.msk [vmem:[#allocation3 + $0xb] ss:$2 sm:$0x7] %vm633_vm6, %v640_v16  ;;  %v658_v27 = vpop.permute.xlu1 %657  ;;  %vm746_vm3 = vmand %vm4516_vm1, %vm4521_vm2  ;;  %v3841_v51 = vld [vmem:[%s5187_s4 + $0x138] sm:$0xff]   ;;  %vm2252_vm14 = vcmask 261120  }
 0x242   :  { %v629_v28 = vsel %vm628_vm8, %v627_v26, %v626_v57  ;;  %v659_v29 = vrot.slane %v658_v27, 7 }
 0x243   :  { %635 = vst.msk [vmem:[#allocation3 + $0xa] ss:$2 sm:$0x7] %vm633_vm6, %v629_v28  ;;  %v646_v31 = vpop.permute.xlu0 %645  ;;  %vm4548_vm6 = vcmp.lt.s32.totalorder %v318_v7, 348 }
 0x244   :  { %v660_v35 = vsel %vm628_vm8, %v659_v29, %v658_v27  ;;  %v647_v36 = vrot.slane %v646_v31, 7  ;;  %vm773_vm9 = vmand %vm4543_vm5, %vm4548_vm6  ;;  %v3822_v27 = vld [vmem:[%s5187_s4 + $0x1d0] sm:$0xff]   ;;  %v3824_v29 = vld [vmem:[%s5187_s4 + $0x158] sm:$0xff]  }
 0x245   :  { %663 = vst.msk [vmem:[#allocation3 + $0xf] ss:$2 sm:$0xf] %vm653_vm11, %v660_v35  ;;  %v724_v38 = vpop.permute.xlu1 %723  ;;  %v3826_v35 = vld [vmem:[%s5187_s4 + $0x1d8] sm:$0xff]  }
 0x246   :  { %v649_v10 = vsel %vm648_vm12, %v647_v36, %v646_v31  ;;  %v725_v39 = vrot.slane %v724_v38, 1  ;;  %v3828_v36 = vld [vmem:[%s5187_s4 + $0x160] sm:$0xff]  }
 0x247   :  { %655 = vst.msk [vmem:[#allocation3 + $0xe] ss:$2 sm:$0xf] %vm653_vm11, %v649_v10  ;;  %v689_v25 = vpop.permute.xlu0 %688  ;;  %v803_v42 = vld [vmem:[#allocation3] sm:$0xff]  ;;  %vm4571_vm11 = vcmp.ge.s32.totalorder %v318_v7, 92  ;;  %v3829_v10 = vld [vmem:[%s5187_s4 + $0x120] sm:$0xff]  }
 0x248   :  { %v726_v11 = vsel %vm648_vm12, %v724_v38, %v725_v39  ;;  %v690_v44 = vrot.slane %v689_v25, 7  ;;  %v822_v45 = vrot.slane %v803_v42, %v4508_v37  ;;  %v815_v46 = vcombine.high %v803_v42, %v803_v42  ;;  %v3827_v38 = vld [vmem:[%s5187_s4 + $0x198] sm:$0xff]   ;;  %v3830_v39 = vld [vmem:[%s5187_s4 + $0x1e0] sm:$0xff]   ;;  %v3834_v42 = vld [vmem:[%s5187_s4 + $0x1e8] sm:$0xff]  }
 0x249   :  { %729 = vst.msk [vmem:[#allocation3 + $0x15] ss:$2 sm:$0x7] %vm696_vm15, %v726_v11  ;;  %v758_v30 = vpop.permute.xlu1 %757  ;;  %vm4584_vm12 = vcmp.lt.s32.totalorder %v318_v7, 416  ;;  %v3817_v7 = vld [vmem:[%s5187_s4 + $0x1c8] sm:$0xff]   ;;  %v3836_v11 = vld [vmem:[%s5187_s4 + $0x170] sm:$0xff]  }
 0x24a   :  { %v692_v47 = vsel %vm691_vm0, %v690_v44, %v689_v25  ;;  %v759_v48 = vrot.slane %v758_v30, 7  ;;  %v830_v49 = vcombine.high %v822_v45, %v822_v45  ;;  %v829_v53 = vrot.slane %v815_v46, %v4508_v37  ;;  %vm792_vm13 = vmand %vm4571_vm11, %vm4584_vm12  ;;  %v3832_v25 = vld [vmem:[%s5187_s4 + $0x168] sm:$0xff]   ;;  %v3837_v46 = vld [vmem:[%s5187_s4 + $0x130] sm:$0xff]  }
 0x24b   :  { %698 = vst.msk [vmem:[#allocation3 + $0x14] ss:$2 sm:$0x7] %vm696_vm15, %v692_v47  ;;  %v739_v50 = vpop.permute.xlu0 %738  ;;  %v928_v60 = vpack.c.bf16 %v822_v45, %v822_v45  ;;  %v3835_v45 = vld [vmem:[%s5187_s4 + $0x1a8] sm:$0xff]   ;;  %v3840_v47 = vld [vmem:[%s5187_s4 + $0x178] sm:$0xff]   ;;  %vm3193_vm15 = vcmask 41984  }
 0x24c   :  { %v760_v54 = vsel %vm691_vm0, %v759_v48, %v758_v30  ;;  %v740_v34 = vrot.slane %v739_v50, 7  ;;  %v929_v56 = vpack.c.bf16 %v830_v49, %v830_v49  ;;  %v831_v40 = vcombine.high %v829_v53, %v829_v53  ;;  %v3838_v30 = vld [vmem:[%s5187_s4 + $0x1f0] sm:$0xff]  }
 0x24d   :  { %763 = vst.msk [vmem:[#allocation3 + $0x19] ss:$2 sm:$0xf] %vm746_vm3, %v760_v54  ;;  %v778_v59 = vpop.permute.xlu1 %777  ;;  %v930_v12 = vpack.c.bf16 %v829_v53, %v829_v53  ;;  %v3844_v53 = vld [vmem:[%s5187_s4 + $0x240] sm:$0xff]  }
 0x24e   :  { %v742_v63 = vsel %vm741_vm4, %v740_v34, %v739_v50  ;;  %v779_v43 = vrot.slane %v778_v59, 1  ;;  %2288 = vmatprep.mubr.bf16.mxu1 %v929_v56  ;;  %v804_v1 = vld [vmem:[#allocation3 + $0x8] sm:$0xff]  ;;  %v931_v3 = vpack.c.bf16 %v831_v40, %v831_v40  ;;  %v3839_v50 = vld [vmem:[%s5187_s4 + $0x1b0] sm:$0xff]  }
 0x24f   :  { %748 = vst.msk [vmem:[#allocation3 + $0x18] ss:$2 sm:$0xf] %vm746_vm3, %v742_v63  ;;  %2289 = vmatmul.mubr.bf16.vlgmr.msra.gmra.mrb[4].mxu1 %v928_v60  ;;  %v766_v2 = vpop.permute.xlu0 %765  ;;  %v4589_v61 = vrot.slane %v804_v1, %v4508_v37  ;;  %v832_v6 = vcombine.high %v804_v1, %v804_v1  ;;  %v3843_v56 = vld [vmem:[%s5187_s4 + $0x1b8] sm:$0xff]   ;;  %v3846_v60 = vld [vmem:[%s5187_s4 + $0x2c0] sm:$0xff]   ;;  %v3850_v1 = vld [vmem:[%s5187_s4 + $0x208] sm:$0xff]  }
 0x250   :  { %v780_v8 = vsel %vm741_vm4, %v778_v59, %v779_v43  ;;  %3443 = vmatpush3.bf16.msra.mxu1 %v3812_v58  ;;  %v767_v9 = vrot.slane %v766_v2, 7  ;;  %2328 = vmatprep.mubr.bf16.mxu0 %v931_v3  ;;  %v3845_v58 = vld [vmem:[%s5187_s4 + $0x200] sm:$0xff]  }
 0x251   :  { %783 = vst.msk [vmem:[#allocation3 + $0x1f] ss:$2 sm:$0x7] %vm773_vm9, %v780_v8  ;;  %v797_v14 = vpop.permute.xlu1 %796  ;;  %3444 = vmatprep.subr.bf16.mxu1 %v3815_v62  ;;  %v847_v15 = vcombine.high %v4589_v61, %v4589_v61  ;;  %v4609_v18 = vrot.slane %v832_v6, %v4508_v37  ;;  %2329 = vmatmul.mubr.bf16.vlgmr.msra.gmra.mrb[8].mxu0 %v930_v12  ;;  %v3849_v62 = vld [vmem:[%s5187_s4 + $0x248] sm:$0xff]   ;;  %v3847_v43 = vld [vmem:[%s5187_s4 + $0x280] sm:$0xff]   ;;  %v3855_v6 = vld [vmem:[%s5187_s4 + $0x2d0] sm:$0xff]  }
 0x252   :  { %v769_v20 = vsel %vm768_vm10, %v767_v9, %v766_v2  ;;  %v798_v21 = vrot.slane %v797_v14, 7  ;;  %3465 = vmatpush3.bf16.msra.mxu0 %v3814_v4  ;;  %v805_v44 = vld [vmem:[#allocation3 + $0x10] sm:$0xff]  ;;  %v932_v59 = vpack.c.bf16 %v4589_v61, %v4589_v61  ;;  %v3851_v2 = vld [vmem:[%s5187_s4 + $0x2c8] sm:$0xff]   ;;  %v3853_v4 = vld [vmem:[%s5187_s4 + $0x250] sm:$0xff]  }
 0x253   :  { %775 = vst.msk [vmem:[#allocation3 + $0x1e] ss:$2 sm:$0x7] %vm773_vm9, %v769_v20  ;;  %v786_v22 = vpop.permute.xlu0 %785  ;;  %v933_v57 = vpack.c.bf16 %v847_v15, %v847_v15  ;;  %v848_v24 = vcombine.high %v4609_v18, %v4609_v18  ;;  %3466 = vmatprep.subr.bf16.mxu0 %v3817_v7  ;;  %v849_v48 = vcombine.high %v805_v44, %v805_v44  ;;  %v3854_v61 = vld [vmem:[%s5187_s4 + $0x210] sm:$0xff]   ;;  %v3857_v8 = vld [vmem:[%s5187_s4 + $0x258] sm:$0xff]   ;;  %v3861_v7 = vld [vmem:[%s5187_s4 + $0x260] sm:$0xff]  }
 0x254   :  { %v799_v16 = vsel %vm768_vm10, %v798_v21, %v797_v14  ;;  %3445 = vmatpush3.bf16.msra.mxu1 %v3816_v13  ;;  %v787_v26 = vrot.slane %v786_v22, 7  ;;  %v4696_v49 = vrot.slane %v805_v44, %v4508_v37  ;;  %v934_v0 = vpack.c.bf16 %v4609_v18, %v4609_v18  ;;  %v3856_v9 = vld [vmem:[%s5187_s4 + $0x290] sm:$0xff]   ;;  %v3858_v12 = vld [vmem:[%s5187_s4 + $0x218] sm:$0xff]   ;;  %v3862_v15 = vld [vmem:[%s5187_s4 + $0x220] sm:$0xff]  }
 0x255   :  { %802 = vst.msk [vmem:[#allocation3 + $0x23] ss:$2 sm:$0xf] %vm792_vm13, %v799_v16  ;;  %2368 = vmatprep.mubr.bf16.mxu1 %v933_v57  ;;  %3446 = vmatprep.subr.bf16.mxu1 %v3819_v17  ;;  %v935_v28 = vpack.c.bf16 %v848_v24, %v848_v24  ;;  %v4711_v54 = vrot.slane %v849_v48, %v4508_v37  ;;  %v3859_v13 = vld [vmem:[%s5187_s4 + $0x2d8] sm:$0xff]   ;;  %v3863_v17 = vld [vmem:[%s5187_s4 + $0x2e0] sm:$0xff]   ;;  %v3865_v18 = vld [vmem:[%s5187_s4 + $0x268] sm:$0xff]  }
 0x256   :  { %v788_v31 = vsel %vm240_vm7, %v787_v26, %v786_v22  ;;  %3467 = vmatpush3.bf16.msra.mxu0 %v3818_v23  ;;  %v864_v34 = vcombine.high %v4696_v49, %v4696_v49  ;;  %v3860_v14 = vld [vmem:[%s5187_s4 + $0x298] sm:$0xff]   ;;  %v3864_v20 = vld [vmem:[%s5187_s4 + $0x2a0] sm:$0xff]   ;;  %v3866_v21 = vld [vmem:[%s5187_s4 + $0x228] sm:$0xff]   ;;  %vm3994_vm7 = vmmov 0  }
 0x257   :  { %794 = vst.msk [vmem:[#allocation3 + $0x22] ss:$2 sm:$0xf] %vm792_vm13, %v788_v31  ;;  %2408 = vmatprep.mubr.bf16.mxu0 %v935_v28  ;;  %3468 = vmatprep.subr.bf16.mxu0 %v3822_v27  ;;  %v865_v40 = vcombine.high %v4711_v54, %v4711_v54  ;;  %v3867_v22 = vld [vmem:[%s5187_s4 + $0x2e8] sm:$0xff]   ;;  %v3869_v57 = vld [vmem:[%s5187_s4 + $0x270] sm:$0xff]   ;;  %v3874_v31 = vld [vmem:[%s5187_s4 + $0x238] sm:$0xff]   ;;  %v938_v44 = vpack.c.bf16 %v4711_v54, %v4711_v54 }
 0x258   :  { %3447 = vmatpush3.bf16.msra.mxu1 %v3820_v19  ;;  %v937_v63 = vpack.c.bf16 %v864_v34, %v864_v34  ;;  %v3868_v24 = vld [vmem:[%s5187_s4 + $0x2a8] sm:$0xff]   ;;  %v3870_v16 = vld [vmem:[%s5187_s4 + $0x230] sm:$0xff]   ;;  %v3873_v19 = vld [vmem:[%s5187_s4 + $0x278] sm:$0xff]  }
 0x259   :  { %3448 = vmatprep.subr.bf16.mxu1 %v3824_v29  ;;  %v939_v3 = vpack.c.bf16 %v865_v40, %v865_v40  ;;  %v3871_v26 = vld [vmem:[%s5187_s4 + $0x2f0] sm:$0xff]   ;;  %v3885_v48 = vld [vmem:[%s5187_s4 + $0x388] sm:$0xff]   ;;  %v3892_v54 = vld [vmem:[%s5187_s4 + $0x3d8] sm:$0xff]  }
 0x25a   :  { %3469 = vmatpush3.bf16.msra.mxu0 %v3823_v32  ;;  %v806_v23 = vld [vmem:[#allocation3 + $0x18] sm:$0xff]  ;;  %v3872_v29 = vld [vmem:[%s5187_s4 + $0x2b0] sm:$0xff]   ;;  %v3875_v32 = vld [vmem:[%s5187_s4 + $0x2f8] sm:$0xff]  }
 0x25b   :  { %3470 = vmatprep.subr.bf16.mxu0 %v3826_v35  ;;  %v866_v27 = vcombine.high %v806_v23, %v806_v23  ;;  %v4806_v28 = vrot.slane %v806_v23, %v4508_v37  ;;  %v3894_v34 = vld [vmem:[%s5187_s4 + $0x360] sm:$0xff]   ;;  %v3916_v23 = vld [vmem:[%s5187_s4 + $0x408] sm:$0xff]  }
 0x25c   :  { %3449 = vmatpush3.bf16.msra.mxu1 %v3825_v33  ;;  %v3877_v33 = vld [vmem:[%s5187_s4 + $0x340] sm:$0xff]  }
 0x25d   :  { %3450 = vmatprep.subr.bf16.mxu1 %v3828_v36  ;;  %v4821_v35 = vrot.slane %v866_v27, %v4508_v37  ;;  %v881_v36 = vcombine.high %v4806_v28, %v4806_v28  ;;  %v3897_v40 = vld [vmem:[%s5187_s4 + $0x3a0] sm:$0xff]   ;;  %v3920_v27 = vld [vmem:[%s5187_s4 + $0x410] sm:$0xff]  }
 0x25e   :  { %3471 = vmatpush3.bf16.msra.mxu0 %v3827_v38  ;;  %v3876_v38 = vld [vmem:[%s5187_s4 + $0x2b8] sm:$0xff]  }
 0x25f   :  { %3472 = vmatprep.subr.bf16.mxu0 %v3830_v39  ;;  %v936_v39 = vpack.c.bf16 %v4696_v49, %v4696_v49  ;;  %v3887_v49 = vld [vmem:[%s5187_s4 + $0x310] sm:$0xff]  }
 0x260   :  { %3451 = vmatpush3.bf16.msra.mxu1 %v3829_v10  ;;  %v3878_v10 = vld [vmem:[%s5187_s4 + $0x300] sm:$0xff]  }
 0x261   :  { %3452 = vmatprep.subr.bf16.mxu1 %v3832_v25  ;;  %v3879_v25 = vld [vmem:[%s5187_s4 + $0x3c0] sm:$0xff]  }
 0x262   :  { %3473 = vmatpush3.bf16.msra.mxu0 %v3831_v41  ;;  %v882_v41 = vcombine.high %v4821_v35, %v4821_v35 }
 0x263   :  { %3474 = vmatprep.subr.bf16.mxu0 %v3834_v42  ;;  %v941_v42 = vpack.c.bf16 %v881_v36, %v881_v36  ;;  %v3926_v36 = vld [vmem:[%s5187_s4 + $0x498] sm:$0xff]  }
 0x264   :  { %3453 = vmatpush3.bf16.msra.mxu1 %v3833_v55  ;;  %v3882_v55 = vld [vmem:[%s5187_s4 + $0x348] sm:$0xff]  }
 0x265   :  { %3454 = vmatprep.subr.bf16.mxu1 %v3836_v11  ;;  %v3880_v11 = vld [vmem:[%s5187_s4 + $0x380] sm:$0xff]  }
 0x266   :  { %3475 = vmatpush3.bf16.msra.mxu0 %v3835_v45  ;;  %v3883_v45 = vld [vmem:[%s5187_s4 + $0x308] sm:$0xff]  }
 0x267   :  { %3476 = vmatprep.subr.bf16.mxu0 %v3838_v30  ;;  %v943_v30 = vpack.c.bf16 %v882_v41, %v882_v41  ;;  %v3932_v41 = vld [vmem:[%s5187_s4 + $0x428] sm:$0xff]  }
 0x268   :  { %3455 = vmatpush3.bf16.msra.mxu1 %v3837_v46  ;;  %v3884_v46 = vld [vmem:[%s5187_s4 + $0x3c8] sm:$0xff]  }
 0x269   :  { %3456 = vmatprep.subr.bf16.mxu1 %v3840_v47  ;;  %v3886_v47 = vld [vmem:[%s5187_s4 + $0x350] sm:$0xff]  }
 0x26a   :  { %3477 = vmatpush3.bf16.msra.mxu0 %v3839_v50  ;;  %v3888_v50 = vld [vmem:[%s5187_s4 + $0x3d0] sm:$0xff]  }
 0x26b   :  { %3478 = vmatprep.subr.bf16.mxu0 %v3842_v52  ;;  %v3889_v52 = vld [vmem:[%s5187_s4 + $0x390] sm:$0xff]  }
 0x26c   :  { %3457 = vmatpush3.bf16.msra.mxu1 %v3841_v51  ;;  %v3890_v51 = vld [vmem:[%s5187_s4 + $0x358] sm:$0xff]  }
 0x26d   :  { %3486 = vmatprep.subr.bf16.mxu1 %v3844_v53  ;;  %v3891_v53 = vld [vmem:[%s5187_s4 + $0x318] sm:$0xff]  }
 0x26e   :  { %3479 = vmatpush3.bf16.msra.mxu0 %v3843_v56  ;;  %v3893_v56 = vld [vmem:[%s5187_s4 + $0x398] sm:$0xff]  }
 0x26f   :  { %2369 = vmatmul.mubr.bf16.vlgmr.msra.gmra.mrb[8].mxu1 %v932_v59  ;;  %3508 = vmatprep.subr.bf16.mxu0 %v3846_v60  ;;  %v3896_v59 = vld [vmem:[%s5187_s4 + $0x3e0] sm:$0xff]   ;;  %v3898_v60 = vld [vmem:[%s5187_s4 + $0x368] sm:$0xff]  }
 0x270   :  { %3487 = vmatpush3.bf16.msra.mxu1 %v3845_v58  ;;  %2448 = vmatprep.mubr.bf16.mxu1 %v937_v63  ;;  %v3895_v58 = vld [vmem:[%s5187_s4 + $0x320] sm:$0xff]   ;;  %v3900_v63 = vld [vmem:[%s5187_s4 + $0x3e8] sm:$0xff]  }
 0x271   :  { %3488 = vmatprep.subr.bf16.mxu1 %v3849_v62  ;;  %2409 = vmatmul.mubr.bf16.vlgmr.msra.gmra.mrb[12].mxu0 %v934_v0  ;;  %v3899_v62 = vld [vmem:[%s5187_s4 + $0x328] sm:$0xff]   ;;  %v807_v0 = vld [vmem:[#allocation3 + $0x20] sm:$0xff] }
 0x272   :  { %3509 = vmatpush3.bf16.msra.mxu0 %v3847_v43  ;;  %2488 = vmatprep.mubr.bf16.mxu0 %v939_v3  ;;  %v3902_v43 = vld [vmem:[%s5187_s4 + $0x370] sm:$0xff]  }
 0x273   :  { %3510 = vmatprep.subr.bf16.mxu0 %v3851_v2  ;;  %v3903_v2 = vld [vmem:[%s5187_s4 + $0x330] sm:$0xff]  }
 0x274   :  { %3489 = vmatpush3.bf16.msra.mxu1 %v3850_v1  ;;  %v3901_v1 = vld [vmem:[%s5187_s4 + $0x3a8] sm:$0xff]   ;;  %v3904_v3 = vld [vmem:[%s5187_s4 + $0x3f0] sm:$0xff]  }
 0x275   :  { %3490 = vmatprep.subr.bf16.mxu1 %v3853_v4  ;;  %v3906_v4 = vld [vmem:[%s5187_s4 + $0x378] sm:$0xff]  }
 0x276   :  { %3511 = vmatpush3.bf16.msra.mxu0 %v3852_v5  ;;  %v883_v5 = vcombine.high %v807_v0, %v807_v0 }
 0x277   :  { %3512 = vmatprep.subr.bf16.mxu0 %v3855_v6  ;;  %v3905_v6 = vld [vmem:[%s5187_s4 + $0x3b0] sm:$0xff]  }
 0x278   :  { %3491 = vmatpush3.bf16.msra.mxu1 %v3854_v61  ;;  %v4916_v61 = vrot.slane %v807_v0, %v4508_v37 }
 0x279   :  { %3492 = vmatprep.subr.bf16.mxu1 %v3857_v8  ;;  %v3907_v8 = vld [vmem:[%s5187_s4 + $0x338] sm:$0xff]  }
 0x27a   :  { %3513 = vmatpush3.bf16.msra.mxu0 %v3856_v9  ;;  %v3908_v9 = vld [vmem:[%s5187_s4 + $0x3f8] sm:$0xff]  }
 0x27b   :  { %3514 = vmatprep.subr.bf16.mxu0 %v3859_v13  ;;  %v4931_v13 = vrot.slane %v883_v5, %v4508_v37  ;;  %v3912_v37 = vld [vmem:[%s5187_s4 + $0x4c0] sm:$0xff]  }
 0x27c   :  { %3493 = vmatpush3.bf16.msra.mxu1 %v3858_v12  ;;  %v3910_v12 = vld [vmem:[%s5187_s4 + $0x440] sm:$0xff]  }
 0x27d   :  { %3494 = vmatprep.subr.bf16.mxu1 %v3861_v7  ;;  %v898_v7 = vcombine.high %v4916_v61, %v4916_v61 }
 0x27e   :  { %3515 = vmatpush3.bf16.msra.mxu0 %v3860_v14  ;;  %v3909_v14 = vld [vmem:[%s5187_s4 + $0x3b8] sm:$0xff]  }
 0x27f   :  { %3516 = vmatprep.subr.bf16.mxu0 %v3863_v17  ;;  %v940_v17 = vpack.c.bf16 %v4806_v28, %v4806_v28  ;;  %v3921_v28 = vld [vmem:[%s5187_s4 + $0x4d0] sm:$0xff]  }
 0x280   :  { %3495 = vmatpush3.bf16.msra.mxu1 %v3862_v15  ;;  %v3911_v15 = vld [vmem:[%s5187_s4 + $0x400] sm:$0xff]  }
 0x281   :  { %3496 = vmatprep.subr.bf16.mxu1 %v3865_v18  ;;  %v899_v18 = vcombine.high %v4931_v13, %v4931_v13 }
 0x282   :  { %3517 = vmatpush3.bf16.msra.mxu0 %v3864_v20  ;;  %v3915_v20 = vld [vmem:[%s5187_s4 + $0x448] sm:$0xff]  }
 0x283   :  { %3518 = vmatprep.subr.bf16.mxu0 %v3867_v22  ;;  %v3913_v22 = vld [vmem:[%s5187_s4 + $0x480] sm:$0xff]  }
 0x284   :  { %3497 = vmatpush3.bf16.msra.mxu1 %v3866_v21  ;;  %v945_v21 = vpack.c.bf16 %v898_v7, %v898_v7  ;;  %v3995_v7 = vmov 0.0|0.0  }
 0x285   :  { %3498 = vmatprep.subr.bf16.mxu1 %v3869_v57  ;;  %v942_v57 = vpack.c.bf16 %v4821_v35, %v4821_v35  ;;  %v3927_v35 = vld [vmem:[%s5187_s4 + $0x460] sm:$0xff]  }
 0x286   :  { %3519 = vmatpush3.bf16.msra.mxu0 %v3868_v24  ;;  %v3917_v24 = vld [vmem:[%s5187_s4 + $0x4c8] sm:$0xff]  }
 0x287   :  { %3520 = vmatprep.subr.bf16.mxu0 %v3871_v26  ;;  %v3919_v26 = vld [vmem:[%s5187_s4 + $0x450] sm:$0xff]  }
 0x288   :  { %3499 = vmatpush3.bf16.msra.mxu1 %v3870_v16  ;;  %v947_v16 = vpack.c.bf16 %v899_v18, %v899_v18  ;;  %v2867_v18 = vld [vmem:[%s5194_s11] sm:$0xff] }
 0x289   :  { %3500 = vmatprep.subr.bf16.mxu1 %v3873_v19  ;;  %v3918_v19 = vld [vmem:[%s5187_s4 + $0x488] sm:$0xff]  }
 0x28a   :  { %3521 = vmatpush3.bf16.msra.mxu0 %v3872_v29  ;;  %v3923_v29 = vld [vmem:[%s5187_s4 + $0x458] sm:$0xff]  }
 0x28b   :  { %3522 = vmatprep.subr.bf16.mxu0 %v3875_v32  ;;  %v3924_v32 = vld [vmem:[%s5187_s4 + $0x418] sm:$0xff]  }
 0x28c   :  { %3501 = vmatpush3.bf16.msra.mxu1 %v3874_v31  ;;  %v3922_v31 = vld [vmem:[%s5187_s4 + $0x490] sm:$0xff]  }
 0x28d   :  { %3530 = vmatprep.subr.bf16.mxu1 %v3877_v33  ;;  %v3925_v33 = vld [vmem:[%s5187_s4 + $0x4d8] sm:$0xff]  }
 0x28e   :  { %3523 = vmatpush3.bf16.msra.mxu0 %v3876_v38  ;;  %v3928_v38 = vld [vmem:[%s5187_s4 + $0x420] sm:$0xff]  }
 0x28f   :  { %2449 = vmatmul.mubr.bf16.vlgmr.msra.gmra.mrb[12].mxu1 %v936_v39  ;;  %3552 = vmatprep.subr.bf16.mxu0 %v3879_v25  ;;  %v3931_v39 = vld [vmem:[%s5187_s4 + $0x468] sm:$0xff]   ;;  %v3930_v25 = vld [vmem:[%s5187_s4 + $0x4a0] sm:$0xff]  }
 0x290   :  { %3531 = vmatpush3.bf16.msra.mxu1 %v3878_v10  ;;  %2528 = vmatprep.mubr.bf16.mxu1 %v941_v42  ;;  %v3929_v10 = vld [vmem:[%s5187_s4 + $0x4e0] sm:$0xff]   ;;  %v3935_v42 = vld [vmem:[%s5187_s4 + $0x470] sm:$0xff]  }
 0x291   :  { %3532 = vmatprep.subr.bf16.mxu1 %v3882_v55  ;;  %2489 = vmatmul.mubr.bf16.vlgmr.msra.gmra.mrb[16].mxu0 %v938_v44  ;;  %v3933_v55 = vld [vmem:[%s5187_s4 + $0x4e8] sm:$0xff]   ;;  %v3936_v44 = vld [vmem:[%s5187_s4 + $0x430] sm:$0xff]  }
 0x292   :  { %3553 = vmatpush3.bf16.msra.mxu0 %v3880_v11  ;;  %2568 = vmatprep.mubr.bf16.mxu0 %v943_v30  ;;  %v3934_v11 = vld [vmem:[%s5187_s4 + $0x4a8] sm:$0xff]   ;;  %v3938_v30 = vld [vmem:[%s5187_s4 + $0x4b0] sm:$0xff]  }
 0x293   :  { %3554 = vmatprep.subr.bf16.mxu0 %v3884_v46  ;;  %v3939_v46 = vld [vmem:[%s5187_s4 + $0x478] sm:$0xff]  }
 0x294   :  { %3533 = vmatpush3.bf16.msra.mxu1 %v3883_v45  ;;  %v3937_v45 = vld [vmem:[%s5187_s4 + $0x4f0] sm:$0xff]  }
 0x295   :  { %3534 = vmatprep.subr.bf16.mxu1 %v3886_v47  ;;  %v3940_v47 = vld [vmem:[%s5187_s4 + $0x438] sm:$0xff]  }
 0x296   :  { %3555 = vmatpush3.bf16.msra.mxu0 %v3885_v48  ;;  %v3941_v48 = vld [vmem:[%s5187_s4 + $0x4f8] sm:$0xff]  }
 0x297   :  { %3556 = vmatprep.subr.bf16.mxu0 %v3888_v50  ;;  %v3943_v50 = vld [vmem:[%s5187_s4 + $0x500] sm:$0xff]  }
 0x298   :  { %3535 = vmatpush3.bf16.msra.mxu1 %v3887_v49  ;;  %v3942_v49 = vld [vmem:[%s5187_s4 + $0x4b8] sm:$0xff]  }
 0x299   :  { %3536 = vmatprep.subr.bf16.mxu1 %v3890_v51  ;;  %v944_v51 = vpack.c.bf16 %v4916_v61, %v4916_v61  ;;  %v2863_v61 = vld [vmem:[%s5193_s10] sm:$0xff] }
 0x29a   :  { %3557 = vmatpush3.bf16.msra.mxu0 %v3889_v52  ;;  %v3993_v52 = vmov 0.0  }
 0x29b   :  { %3558 = vmatprep.subr.bf16.mxu0 %v3892_v54  ;;  %v3944_v54 = vld [vmem:[%s5187_s4 + $0x508] sm:$0xff]  }
 0x29c   :  { %3537 = vmatpush3.bf16.msra.mxu1 %v3891_v53  ;;  %v946_v53 = vpack.c.bf16 %v4931_v13, %v4931_v13 }
 0x29d   :  { %3538 = vmatprep.subr.bf16.mxu1 %v3894_v34  ;;  %v3223_v34 = vld.sshfl [vmem:[#allocation3 + $0x28] sm:$0x3 pattern:$0x76325410] }
 0x29e   :  { %3559 = vmatpush3.bf16.msra.mxu0 %v3893_v56  ;;  %v948_v56 = vpack.c.bf16 %v3223_v34, %v3223_v34 }
 0x29f   :  { %3560 = vmatprep.subr.bf16.mxu0 %v3896_v59  ;;  %v2697_v59 = vld [vmem:[%s5184_s1] sm:$0x3] }
 0x2a0   :  { %3539 = vmatpush3.bf16.msra.mxu1 %v3895_v58  ;;  %v2698_v58 = vld [vmem:[%s5189_s6] sm:$0xff] }
 0x2a1   :  { %3540 = vmatprep.subr.bf16.mxu1 %v3898_v60  ;;  %v2781_v60 = vld [vmem:[%s5191_s8] sm:$0xff] }
 0x2a2   :  { %3561 = vmatpush3.bf16.msra.mxu0 %v3897_v40  ;;  %v2780_v40 = vld [vmem:[%s5185_s2] sm:$0x3] }
 0x2a3   :  { %3562 = vmatprep.subr.bf16.mxu0 %v3900_v63  ;;  %v3224_v63 = vld [vmem:[%s5188_s5] ss:$0 sm:$0xff] }
 0x2a4   :  { %3541 = vmatpush3.bf16.msra.mxu1 %v3899_v62 }
 0x2a5   :  { %3542 = vmatprep.subr.bf16.mxu1 %v3902_v43 }
 0x2a6   :  { %3563 = vmatpush3.bf16.msra.mxu0 %v3901_v1 }
 0x2a7   :  { %3564 = vmatprep.subr.bf16.mxu0 %v3904_v3 }
 0x2a8   :  { %3543 = vmatpush3.bf16.msra.mxu1 %v3903_v2 }
 0x2a9   :  { %3544 = vmatprep.subr.bf16.mxu1 %v3906_v4 }
 0x2aa   :  { %3565 = vmatpush3.bf16.msra.mxu0 %v3905_v6  ;;  %v2864_v6 = vld [vmem:[%s5193_s10 + $0x8] sm:$0xff] }
 0x2ab   :  { %3566 = vmatprep.subr.bf16.mxu0 %v3908_v9 }
 0x2ac   :  { %3545 = vmatpush3.bf16.msra.mxu1 %v3907_v8 }
 0x2ad   :  { %3574 = vmatprep.subr.bf16.mxu1 %v3910_v12  ;;  %v3726_v12 = vpack.c.bf16 %v2864_v6, %v2863_v61 }
 0x2ae   :  { %3567 = vmatpush3.bf16.msra.mxu0 %v3909_v14 }
 0x2af   :  { %2529 = vmatmul.mubr.bf16.vlgmr.msra.gmra.mrb[16].mxu1 %v940_v17  ;;  %3596 = vmatprep.subr.bf16.mxu0 %v3912_v37  ;;  %v2866_v17 = vld [vmem:[%s5193_s10 + $0x18] sm:$0xff] }
 0x2b0   :  { %3575 = vmatpush3.bf16.msra.mxu1 %v3911_v15  ;;  %2608 = vmatprep.mubr.bf16.mxu1 %v945_v21  ;;  %v2865_v15 = vld [vmem:[%s5193_s10 + $0x10] sm:$0xff] }
 0x2b1   :  { %3576 = vmatprep.subr.bf16.mxu1 %v3915_v20  ;;  %2569 = vmatmul.mubr.bf16.vlgmr.msra.gmra.mrb[20].mxu0 %v942_v57  ;;  %v3729_v37 = vpack.c.bf16 %v2866_v17, %v2865_v15  ;;  %v2868_v20 = vld [vmem:[%s5194_s11 + $0x8] sm:$0xff]  ;;  %v2870_v57 = vld [vmem:[%s5194_s11 + $0x18] sm:$0xff]  ;;  %v3388_v17 = vld [vmem:[%s5190_s7] ss:$0 sm:$0xff] }
 0x2b2   :  { %3597 = vmatpush3.bf16.msra.mxu0 %v3913_v22  ;;  %2648 = vmatprep.mubr.bf16.mxu0 %v947_v16  ;;  %v3720_v21 = vpack.c.bf16 %v2868_v20, %v2867_v18  ;;  %v2869_v22 = vld [vmem:[%s5194_s11 + $0x10] sm:$0xff]  ;;  %v3018_v18 = vld [vmem:[%s5195_s12 + $0x8] sm:$0xff] }
 0x2b3   :  { %3598 = vmatprep.subr.bf16.mxu0 %v3917_v24 }
 0x2b4   :  { %3577 = vmatpush3.bf16.msra.mxu1 %v3916_v23  ;;  %v3723_v23 = vpack.c.bf16 %v2870_v57, %v2869_v22 }
 0x2b5   :  { %3578 = vmatprep.subr.bf16.mxu1 %v3919_v26 }
 0x2b6   :  { %3599 = vmatpush3.bf16.msra.mxu0 %v3918_v19 }
 0x2b7   :  { %3600 = vmatprep.subr.bf16.mxu0 %v3921_v28 }
 0x2b8   :  { %3579 = vmatpush3.bf16.msra.mxu1 %v3920_v27 }
 0x2b9   :  { %3580 = vmatprep.subr.bf16.mxu1 %v3923_v29 }
 0x2ba   :  { %3601 = vmatpush3.bf16.msra.mxu0 %v3922_v31 }
 0x2bb   :  { %3602 = vmatprep.subr.bf16.mxu0 %v3925_v33 }
 0x2bc   :  { %3581 = vmatpush3.bf16.msra.mxu1 %v3924_v32 }
 0x2bd   :  { %3582 = vmatprep.subr.bf16.mxu1 %v3927_v35 }
 0x2be   :  { %3603 = vmatpush3.bf16.msra.mxu0 %v3926_v36 }
 0x2bf   :  { %3604 = vmatprep.subr.bf16.mxu0 %v3929_v10 }
 0x2c0   :  { %3583 = vmatpush3.bf16.msra.mxu1 %v3928_v38 }
 0x2c1   :  { %3584 = vmatprep.subr.bf16.mxu1 %v3931_v39 }
 0x2c2   :  { %3605 = vmatpush3.bf16.msra.mxu0 %v3930_v25 }
 0x2c3   :  { %3606 = vmatprep.subr.bf16.mxu0 %v3933_v55 }
 0x2c4   :  { %3585 = vmatpush3.bf16.msra.mxu1 %v3932_v41 }
 0x2c5   :  { %3586 = vmatprep.subr.bf16.mxu1 %v3935_v42 }
 0x2c6   :  { %3607 = vmatpush3.bf16.msra.mxu0 %v3934_v11 }
 0x2c7   :  { %3608 = vmatprep.subr.bf16.mxu0 %v3937_v45 }
 0x2c8   :  { %3587 = vmatpush3.bf16.msra.mxu1 %v3936_v44 }
 0x2c9   :  { %3588 = vmatprep.subr.bf16.mxu1 %v3939_v46 }
 0x2ca   :  { %3609 = vmatpush3.bf16.msra.mxu0 %v3938_v30 }
 0x2cb   :  { %3610 = vmatprep.subr.bf16.mxu0 %v3941_v48 }
 0x2cc   :  { %3589 = vmatpush3.bf16.msra.mxu1 %v3940_v47 }
 0x2cd   :  { %3649 = vmatprep.subr.bf16.mxu1 %v3993_v52 }
 0x2ce   :  { %3611 = vmatpush3.bf16.msra.mxu0 %v3942_v49 }
 0x2cf   :  { %2609 = vmatmul.mubr.bf16.vlgmr.msra.gmra.mrb[20].mxu1 %v944_v51  ;;  %3725 = vmatprep.subr.bf16.mxu0 %v3995_v7 }
 0x2d0   :  { %3650 = vmatpush3.bf16.msra.mxu1 %v3943_v50  ;;  %3653 = vmatprep.mubr.msk.bf16.mxu1 %vm3994_vm7, %v3993_v52 }
 0x2d1   :  { %3651 = vmatprep.subr.bf16.mxu1 %v3993_v52  ;;  %2649 = vmatmul.mubr.bf16.vlgmr.msra.gmra.mrb[24].mxu0 %v946_v53 }
 0x2d2   :  { %3686 = vmatprep.mubr.msk.f32.mxu0 %vm3994_vm7, %v3993_v52  ;;  %3727 = vmatpush3.bf16.msra.mxu0 %v3726_v12 }
 0x2d3   :  { %3728 = vmatprep.subr.bf16.mxu0 %v3995_v7 }
 0x2d4   :  { %3652 = vmatpush3.bf16.msra.mxu1 %v3944_v54 }
 0x2d5   :  { %3657 = vmatprep.subr.mxu1 %v3993_v52 }
 0x2d6   :  { %3730 = vmatpush3.bf16.msra.mxu0 %v3729_v37  ;;  %v3017_v37 = vld [vmem:[%s5195_s12] sm:$0xff] }
 0x2d7   :  { %3654 = vmatmul.mubr.msk.bf16.vlgmr.msra.gmra.mrb[24].mxu1 %vm2252_vm14, %v948_v56  ;;  %3737 = vmatprep.subr.bf16.mxu0 %v3995_v7  ;;  %v3732_v57 = vpack.c.bf16 %v3018_v18, %v3017_v37 }
 0x2d8   :  { %3658 = vmatpush3.msra.mxu1 %v2698_v58  ;;  %3659 = vmatprep.mubr.msk.f32.mxu1 %vm3994_vm7, %v3993_v52 }
 0x2d9   :  { %3662 = vmatprep.subr.mxu1 %v3993_v52 }
 0x2df   :  { %3660 = vmatmul.mubr.msk.f32.vlgmr.msra.gmra.mrb[28].mxu1 %vm628_vm8, %v2697_v59 }
 0x2e0   :  { %3663 = vmatpush3.msra.mxu1 %v2781_v60  ;;  %3664 = vmatprep.mubr.msk.f32.mxu1 %vm3994_vm7, %v3993_v52 }
 0x2e1   :  { %3719 = vmatprep.subr.bf16.mxu1 %v3995_v7 }
 0x2e3   :  { %3665 = vmatmul.mubr.msk.f32.vlgmr.msra.gmra.mrb[30].mxu1 %vm628_vm8, %v2780_v40  ;;  %vm3119_vm8 = vcmask 523264  }
 0x2e4   :  { %3675 = vmatprep.mubr.msk.f32.mxu1 %vm3994_vm7, %v3993_v52  ;;  %3721 = vmatpush3.bf16.msra.mxu1 %v3720_v21 }
 0x2e5   :  { %3722 = vmatprep.subr.bf16.mxu1 %v3995_v7 }
 0x2e8   :  { %3724 = vmatpush3.bf16.msra.mxu1 %v3723_v23  ;;  %v3390_v23 = vld [vmem:[%s5192_s9] ss:$0 sm:$0xff] }
 0x2e9   :  { %3731 = vmatprep.subr.bf16.mxu1 %v3995_v7 }
 0x322   :  { %v3414_v62 = vpop.f32.mrb[4].mxu1 }
 0x323   :  { %v3415_v43 = vpop.f32.mrb[5].mxu1 }
 0x324   :  { %v3416_v0 = vadd.f32 %v3415_v43, %v3414_v62  ;;  %v3417_v1 = vpop.f32.mrb[6].mxu1  ;;  %v3436_v2 = vpop.f32.mrb[8].mxu0 }
 0x325   :  { %v3418_v3 = vpop.f32.mrb[7].mxu1  ;;  %v3437_v5 = vpop.f32.mrb[9].mxu0 }
 0x326   :  { %v2291_v4 = vadd.f32 %v3416_v0, %v3224_v63  ;;  %v3438_v8 = vadd.f32 %v3437_v5, %v3436_v2  ;;  %v3439_v9 = vpop.f32.mrb[10].mxu0 }
 0x327   :  { %v3440_v13 = vpop.f32.mrb[11].mxu0 }
 0x328   :  { %v2331_v14 = vadd.f32 %v3438_v8, %v2291_v4 }
 0x342   :  { %v3458_v24 = vpop.f32.mrb[8].mxu1 }
 0x343   :  { %v3459_v16 = vpop.f32.mrb[9].mxu1 }
 0x344   :  { %v3460_v26 = vadd.f32 %v3459_v16, %v3458_v24  ;;  %v3461_v19 = vpop.f32.mrb[10].mxu1  ;;  %v3480_v27 = vpop.f32.mrb[12].mxu0  ;;  %v3019_v16 = vld [vmem:[%s5195_s12 + $0x10] sm:$0xff] }
 0x345   :  { %v3462_v28 = vpop.f32.mrb[11].mxu1  ;;  %v3481_v31 = vpop.f32.mrb[13].mxu0 }
 0x346   :  { %v2371_v29 = vadd.f32 %v3460_v26, %v2331_v14  ;;  %v3482_v32 = vadd.f32 %v3481_v31, %v3480_v27  ;;  %v3483_v33 = vpop.f32.mrb[14].mxu0  ;;  %v3020_v26 = vld [vmem:[%s5195_s12 + $0x18] sm:$0xff] }
 0x347   :  { %v3484_v35 = vpop.f32.mrb[15].mxu0  ;;  %v3105_v33 = vld [vmem:[%s5197_s14 + $0x8] sm:$0xff] }
 0x348   :  { %v2411_v36 = vadd.f32 %v3482_v32, %v2371_v29  ;;  %v3735_v29 = vpack.c.bf16 %v3020_v26, %v3019_v16  ;;  %v3104_v32 = vld [vmem:[%s5197_s14] sm:$0xff] }
 0x349   :  { %v3738_v35 = vpack.c.bf16 %v3105_v33, %v3104_v32 }
 0x362   :  { %v3502_v38 = vpop.f32.mrb[12].mxu1 }
 0x363   :  { %v3503_v10 = vpop.f32.mrb[13].mxu1 }
 0x364   :  { %v3504_v39 = vadd.f32 %v3503_v10, %v3502_v38  ;;  %v3505_v25 = vpop.f32.mrb[14].mxu1  ;;  %v3524_v41 = vpop.f32.mrb[16].mxu0  ;;  %v3108_v10 = vld [vmem:[%s5197_s14 + $0x20] sm:$0xff] }
 0x365   :  { %v3506_v55 = vpop.f32.mrb[15].mxu1  ;;  %v3525_v11 = vpop.f32.mrb[17].mxu0 }
 0x366   :  { %v2451_v42 = vadd.f32 %v3504_v39, %v2411_v36  ;;  %v3526_v44 = vadd.f32 %v3525_v11, %v3524_v41  ;;  %v3527_v45 = vpop.f32.mrb[18].mxu0  ;;  %v3107_v36 = vld [vmem:[%s5197_s14 + $0x18] sm:$0xff]  ;;  %v3109_v39 = vld [vmem:[%s5197_s14 + $0x28] sm:$0xff]  ;;  %v3110_v41 = vld [vmem:[%s5197_s14 + $0x30] sm:$0xff] }
 0x367   :  { %v3528_v46 = vpop.f32.mrb[19].mxu0  ;;  %v3744_v25 = vpack.c.bf16 %v3109_v39, %v3108_v10  ;;  %v3111_v55 = vld [vmem:[%s5197_s14 + $0x38] sm:$0xff] }
 0x368   :  { %v2491_v30 = vadd.f32 %v3526_v44, %v2451_v42  ;;  %v3747_v42 = vpack.c.bf16 %v3111_v55, %v3110_v41 }
 0x382   :  { %v3546_v47 = vpop.f32.mrb[16].mxu1 }
 0x383   :  { %v3547_v48 = vpop.f32.mrb[17].mxu1 }
 0x384   :  { %v3548_v49 = vadd.f32 %v3547_v48, %v3546_v47  ;;  %v3549_v50 = vpop.f32.mrb[18].mxu1  ;;  %v3568_v51 = vpop.f32.mrb[20].mxu0 }
 0x385   :  { %v3550_v53 = vpop.f32.mrb[19].mxu1  ;;  %v3569_v34 = vpop.f32.mrb[21].mxu0 }
 0x386   :  { %v2531_v54 = vadd.f32 %v3548_v49, %v2491_v30  ;;  %v3570_v56 = vadd.f32 %v3569_v34, %v3568_v51  ;;  %v3571_v58 = vpop.f32.mrb[22].mxu0  ;;  %v3396_v53 = vld [vmem:[%s5198_s15] ss:$0 sm:$0xff] }
 0x387   :  { %v3572_v59 = vpop.f32.mrb[23].mxu0 }
 0x388   :  { %v2571_v60 = vadd.f32 %v3570_v56, %v2531_v54 }
 0x3a2   :  { %v3590_v40 = vpop.f32.mrb[20].mxu1 }
 0x3a3   :  { %v3591_v62 = vpop.f32.mrb[21].mxu1 }
 0x3a4   :  { %v3592_v63 = vadd.f32 %v3591_v62, %v3590_v40  ;;  %v3593_v43 = vpop.f32.mrb[22].mxu1  ;;  %v3612_v0 = vpop.f32.mrb[24].mxu0 }
 0x3a5   :  { %v3594_v1 = vpop.f32.mrb[23].mxu1  ;;  %v3613_v3 = vpop.f32.mrb[25].mxu0 }
 0x3a6   :  { %v2611_v2 = vadd.f32 %v3592_v63, %v2571_v60  ;;  %v3614_v4 = vadd.f32 %v3613_v3, %v3612_v0  ;;  %v3615_v5 = vpop.f32.mrb[26].mxu0 }
 0x3a7   :  { %v3616_v61 = vpop.f32.mrb[27].mxu0 }
 0x3a8   :  { %v2651_v6 = vadd.f32 %v3614_v4, %v2611_v2 }
 0x3aa   :  { %v2690_v8 = vpop.f32.mrb[24].mxu1 }
 0x3ab   :  { %v2691_v9 = vadd.f32 %v2690_v8, %v2651_v6  ;;  %v3655_v12 = vpop.f32.mrb[25].mxu1 }
 0x3ac   :  { %v2693_v13 = vpop.f32.mrb[26].mxu1 }
 0x3ad   :  { %v2696_v14 = vmax.f32 %v2691_v9, 0.0  ;;  %v3656_v15 = vpop.f32.mrb[27].mxu1 }
 0x3af   :  { %3687 = vmatmul.mubr.msk.f32.vlgmr.msra.gmra.mrb[28].mxu0 %vm2252_vm14, %v2696_v14 }
 0x3b0   :  { %3716 = vmatprep.mubr.msk.f32.mxu0 %vm3994_vm7, %v3993_v52  ;;  %3739 = vmatpush3.bf16.msra.mxu0 %v3738_v35 }
 0x3b1   :  { %3740 = vmatprep.subr.bf16.mxu0 %v3995_v7 }
 0x3b2   :  { %v2775_v20 = vpop.f32.mrb[28].mxu1 }
 0x3b3   :  { %v2776_v21 = vadd.f32 %v3388_v17, %v2775_v20  ;;  %v3661_v22 = vpop.f32.mrb[29].mxu1 }
 0x3b5   :  { %v2779_v24 = vmax.f32 %v2776_v21, 0.0 }
 0x3b6   :  { %v2858_v19 = vpop.f32.mrb[30].mxu1 }
 0x3b7   :  { %3676 = vmatmul.mubr.msk.f32.vlgmr.msra.gmra.mrb[32].mxu1 %vm2252_vm14, %v2779_v24  ;;  %v2859_v27 = vadd.f32 %v3390_v23, %v2858_v19  ;;  %v3666_v28 = vpop.f32.mrb[31].mxu1 }
 0x3b8   :  { %3733 = vmatpush3.bf16.msra.mxu1 %v3732_v57  ;;  %3697 = vmatprep.mubr.msk.f32.mxu1 %vm3994_vm7, %v3993_v52  ;;  %v3106_v52 = vld [vmem:[%s5197_s14 + $0x10] sm:$0xff] }
 0x3b9   :  { %3734 = vmatprep.subr.bf16.mxu1 %v3995_v7  ;;  %v2862_v31 = vmax.f32 %v2859_v27, 0.0  ;;  %v3741_v38 = vpack.c.bf16 %v3107_v36, %v3106_v52 }
 0x3bb   :  { %3742 = vmatpush3.bf16.msra.mxu0 %v3741_v38 }
 0x3bc   :  { %3736 = vmatpush3.bf16.msra.mxu1 %v3735_v29  ;;  %3743 = vmatprep.subr.bf16.mxu0 %v3995_v7 }
 0x3bf   :  { %3698 = vmatmul.mubr.msk.f32.vlgmr.msra.gmra.mrb[34].mxu1 %vm2252_vm14, %v2862_v31  ;;  %3745 = vmatpush3.bf16.msra.mxu0 %v3744_v25 }
 0x3c0   :  { %3746 = vmatprep.subr.bf16.mxu0 %v3995_v7  ;;  %v3395_v7 = vld [vmem:[%s5196_s13] ss:$0 sm:$0xff]  ;;  %s3996_s13 = smov [#allocation4]  }
 0x3c1   :  { %s3212_s6 = sshll.u32 %s3996_s13, 4  ;;  %s3213_s6 = int_to_ptr.vmem [resolvable:$true] %s3212_s6 }
 0x3c2   :  { %s3949_s15 = scalar_lea.vmem %s3213_s6, 32  ;;  %p3954_p1 = scmp.lt.s32.totalorder %s3213_s6, %s3213_s6 }
 0x3c3   :  { %3748 = vmatpush3.bf16.msra.mxu0 %v3747_v42  ;;  %p3950_p0 = scmp.ne.s32.totalorder %s3213_s6, %s3949_s15  ;;  %p3955_p2 = scmp.lt.s32.totalorder %s3949_s15, %s3949_s15 }
 0x3c5   :  { %p3956_p3 = por %p3955_p2, %p3954_p1 }
 0x3c7   :  { %p3957_p4 = pnand %p3956_p3, %p3950_p0 }
 0x482   :  { %v3013_v11 = vpop.f32.mrb[28].mxu0 }
 0x483   :  { %v3688_v44 = vpop.f32.mrb[29].mxu0 }
 0x48a   :  { %v2940_v45 = vpop.f32.mrb[32].mxu1 }
 0x48b   :  { %v3014_v46 = vadd.f32 %v3013_v11, %v2940_v45  ;;  %v3677_v30 = vpop.f32.mrb[33].mxu1 }
 0x492   :  { %v3090_v47 = vpop.f32.mrb[34].mxu1 }
 0x493   :  { %v3094_v48 = vadd.f32 %v3090_v47, %v3014_v46  ;;  %v3699_v49 = vpop.f32.mrb[35].mxu1 }
 0x495   :  { %v3102_v50 = vadd.f32 %v3395_v7, %v3094_v48 }
 0x497   :  { %v3103_v51 = vmax.f32 %v3102_v50, 0.0 }
 0x499   :  { %3717 = vmatmul.mubr.msk.f32.vlgmr.msra.gmra.mrb[30].mxu0 %vm3119_vm8, %v3103_v51 }
 0x56c   :  { %v3189_v54 = vpop.f32.mrb[30].mxu0 }
 0x56d   :  { %v3190_v34 = vadd.f32 %v3396_v53, %v3189_v54  ;;  %v3718_v56 = vpop.f32.mrb[31].mxu0 }
 0x56f   :  { %v3194_v58 = vsel %vm3193_vm15, %v3190_v34, -inf }
 0x570   :  { %3195 = vmax.xlane.f32.xlu0 %v3194_v58 }
 0x5fd   :  { %v3196_v59 = vpop.xlane.xlu0 %3195 }
 0x5fe   :  { %v3197_v60 = vsub.f32 %v3190_v34, %v3196_v59 }
 0x600   :  { %v3198_v40 = vmul.f32 1.442695, %v3197_v60 }
 0x602   :  { %3945 = vpow2.f32 %v3198_v40 }
 0x60c   :  { %v3946_v62 = vpop.eup %3945 }
 0x60d   :  { %v3200_v63 = vsel %vm3193_vm15, %v3946_v62, 0.0 }
 0x60e   :  { %3201 = vadd.xlane.f32.xlu1 %v3200_v63 }
 0x69b   :  { %v3202_v43 = vpop.xlane.xlu1 %3201 }
 0x69c   :  { %3947 = vrcp.f32 %v3202_v43 }
 0x6a6   :  { %v3948_v0 = vpop.eup %3947 }
 0x6a7   :  { %v3204_v1 = vmul.f32 %v3948_v0, %v3946_v62 }
 0x6a9   :  { %3205 = vst.msk [vmem:[#allocation4] sm:$0x3] %vm3193_vm15, %v3204_v1 }
 0x6aa   :  { %3960 = shalt.err (!%p3957_p4)
}
 0x6ab   :  { %s3961_s28 = scalar_lea.hbm %s5199_s16, 32 }
 0x6ac   :  { %p3962_p5 = scmp.ne.s32.totalorder %s5199_s16, %s3961_s28  ;;  %p3965_p6 = scmp.lt.u32.totalorder %s3961_s28, %s5199_s16 }
 0x6ae   :  { %p3967_p7 = pnand %p3965_p6, %p3962_p5 }
 0x6b0   :  { %3970 = shalt.err (!%p3967_p7)
}
 0x6b1   :  { %3215 = dma.vmem_to_hbm [thread:$0]  %s3213_s6, 32, %s5199_s16, [#allocation5]  }
 0x6b2   :  { %3971 = dma.done.wait [#allocation5], 32  }
 0x6b3   :  { %3972 = vsyncadd [#allocation5], 4294967264 }
 0x6b4   :  { %3219 = vsyncpa [#allocation5], 1 }

</bundles_post_ra>
